<compile_context>
chip_gen: v6e
topology: v6e:2x2x1
jax: 0.10.0
libtpu: 0.0.40
codegen_flags: <defaults>
</compile_context>

<pallas_src>
import functools
import math

import jax
import jax.numpy as jnp
from jax.experimental import pallas as pl
from jax.experimental.pallas import tpu as pltpu


# ----------------------------------------------------------------------------
# Helpers
# ----------------------------------------------------------------------------
def _round_up(x, m):
    return (x + m - 1) // m * m


def _pick_tiles(M, K, N):
    """Tile / padded sizes for the (M,K)x(K,N) matmul.

    * N padded lane-dense (x128); tn=256 whenever Np % 256 == 0 (fills 256-wide MXU).
    * K <= 128: single full-K block.  K > 128: pad to x256 so tk is 256 (or 512).
    * M tiled so the parallel grid has >= 2 blocks whenever M >= 16 (v7x megacore),
      with tiles up to 512 rows for large M.
    """
    # N
    Np = _round_up(N, 128)
    if Np % 256 == 0:
        tn = 256
    else:
        tn = 128
    # K
    if K <= 128:
        Kp = _round_up(K, 8)
        tk = Kp
    else:
        Kp = _round_up(K, 256)
        tk = 512 if Kp % 512 == 0 else 256
    # M
    Mp8 = _round_up(M, 8)
    if Mp8 >= 1024:
        tm = 512
    elif Mp8 >= 512:
        tm = 256
    elif Mp8 >= 16:
        tm = min(256, _round_up((Mp8 + 1) // 2, 8))   # >= 2 M tiles
    else:
        tm = Mp8
    Mp = _round_up(Mp8, tm)
    return tm, tn, tk, Mp, Np, Kp


# ----------------------------------------------------------------------------
# Pallas kernel: tiled matmul with K-reduction accumulator + fused bias/activation.
# ----------------------------------------------------------------------------
def _matmul_bias_act_kernel(x_ref, w_ref, b_ref, o_ref, acc_ref, *, activation):
    @pl.when(pl.program_id(2) == 0)
    def _init():
        acc_ref[...] = jnp.zeros_like(acc_ref)

    acc_ref[...] += jnp.dot(x_ref[...], w_ref[...],
                            preferred_element_type=jnp.float32)

    @pl.when(pl.program_id(2) == pl.num_programs(2) - 1)
    def _epilogue():
        acc = acc_ref[...] + b_ref[...]          # (tm, tn) + (1, tn)
        if activation == "relu":
            acc = jnp.maximum(acc, 0.0)
        elif activation == "sigmoid":
            acc = jax.nn.sigmoid(acc)
        o_ref[...] = acc.astype(o_ref.dtype)


def pallas_linear(x, w, b, activation="none", out_dtype=jnp.float32):
    """x: (M, K), w: (K, N), b: (N,) -> (M, N) out_dtype.  bf16 MXU inputs, f32 accumulate."""
    M, K = x.shape
    K2, N = w.shape
    assert K == K2
    tm, tn, tk, Mp, Np, Kp = _pick_tiles(M, K, N)

    xp = jnp.pad(x.astype(jnp.bfloat16), ((0, Mp - M), (0, Kp - K)))
    wp = jnp.pad(w.astype(jnp.bfloat16), ((0, Kp - K), (0, Np - N)))
    bp = jnp.pad(b.astype(jnp.float32), (0, Np - N)).reshape(1, Np)

    kernel = functools.partial(_matmul_bias_act_kernel, activation=activation)
    out_bytes = Mp * Np * jnp.dtype(out_dtype).itemsize
    cost = pl.CostEstimate(
        flops=2 * Mp * Np * Kp,
        transcendentals=0,
        bytes_accessed=(Mp * Kp + Kp * Np) * 2 + Np * 4 + out_bytes,
    )
    out = pl.pallas_call(
        kernel,
        out_shape=jax.ShapeDtypeStruct((Mp, Np), out_dtype),
        grid_spec=pltpu.PrefetchScalarGridSpec(
            num_scalar_prefetch=0,
            grid=(Mp // tm, Np // tn, Kp // tk),
            in_specs=[
                # TODO(synk): pipeline_mode=pl.Buffered(3) on these two specs may help
                #             hide DMA on v5e's lower HBM bandwidth; left at default depth.
                pl.BlockSpec((tm, tk), lambda i, j, k: (i, k)),
                pl.BlockSpec((tk, tn), lambda i, j, k: (k, j)),
                pl.BlockSpec((1, tn), lambda i, j, k: (0, j)),
            ],
            out_specs=pl.BlockSpec((tm, tn), lambda i, j, k: (i, j)),
            scratch_shapes=[pltpu.VMEM((tm, tn), jnp.float32)],
        ),
        compiler_params=pltpu.CompilerParams(
            dimension_semantics=("parallel", "parallel", "arbitrary"),
            vmem_limit_bytes=32 * 1024 * 1024,   # safe on v7x's 64 MiB physical VMEM
        ),
        cost_estimate=cost,
    )(xp, wp, bp)
    return out[:M, :N]


# ----------------------------------------------------------------------------
# Fused ROI box head: fc1 -> ReLU -> fc2 -> ReLU -> (cls_score | bbox_pred).
# All weights live in VMEM; intermediates never hit HBM. Grid over M tiles only.
# ----------------------------------------------------------------------------
def _roi_box_head_kernel(x_ref, w1_ref, b1_ref, w2_ref, b2_ref, w3_ref, b3_ref, o_ref):
    h = jnp.dot(x_ref[...], w1_ref[...], preferred_element_type=jnp.float32) + b1_ref[...]
    h = jnp.maximum(h, 0.0).astype(jnp.bfloat16)
    h = jnp.dot(h, w2_ref[...], preferred_element_type=jnp.float32) + b2_ref[...]
    h = jnp.maximum(h, 0.0).astype(jnp.bfloat16)
    out = jnp.dot(h, w3_ref[...], preferred_element_type=jnp.float32) + b3_ref[...]
    o_ref[...] = out.astype(o_ref.dtype)


def pallas_roi_box_head(x, w1, b1, w2, b2, w3, b3):
    """x: (M, K1) -> (M, N3) f32 through fc1/relu/fc2/relu/head in one kernel."""
    M, K1 = x.shape
    D1 = w1.shape[1]
    D2 = w2.shape[1]
    N3 = w3.shape[1]

    K1p = _round_up(K1, 128) if K1 > 128 else _round_up(K1, 8)
    D1p = _round_up(D1, 128)
    D2p = _round_up(D2, 128)
    N3p = _round_up(N3, 128)

    Mp8 = _round_up(M, 8)
    if Mp8 >= 16:
        tm = min(512, _round_up((Mp8 + 1) // 2, 8))   # >= 2 parallel tiles (v7x megacore)
    else:
        tm = Mp8
    Mp = _round_up(Mp8, tm)

    xp = jnp.pad(x.astype(jnp.bfloat16), ((0, Mp - M), (0, K1p - K1)))
    w1p = jnp.pad(w1.astype(jnp.bfloat16), ((0, K1p - K1), (0, D1p - D1)))
    b1p = jnp.pad(b1.astype(jnp.float32), (0, D1p - D1)).reshape(1, D1p)
    w2p = jnp.pad(w2.astype(jnp.bfloat16), ((0, D1p - D1), (0, D2p - D2)))
    b2p = jnp.pad(b2.astype(jnp.float32), (0, D2p - D2)).reshape(1, D2p)
    w3p = jnp.pad(w3.astype(jnp.bfloat16), ((0, D2p - D2), (0, N3p - N3)))
    b3p = jnp.pad(b3.astype(jnp.float32), (0, N3p - N3)).reshape(1, N3p)

    flops = 2 * Mp * (K1p * D1p + D1p * D2p + D2p * N3p)
    bytes_accessed = (Mp * K1p + K1p * D1p + D1p * D2p + D2p * N3p) * 2 + Mp * N3p * 4
    out = pl.pallas_call(
        _roi_box_head_kernel,
        out_shape=jax.ShapeDtypeStruct((Mp, N3p), jnp.float32),
        grid_spec=pltpu.PrefetchScalarGridSpec(
            num_scalar_prefetch=0,
            grid=(Mp // tm,),
            in_specs=[
                pl.BlockSpec((tm, K1p), lambda i: (i, 0)),
                pl.BlockSpec((K1p, D1p), lambda i: (0, 0)),
                pl.BlockSpec((1, D1p), lambda i: (0, 0)),
                pl.BlockSpec((D1p, D2p), lambda i: (0, 0)),
                pl.BlockSpec((1, D2p), lambda i: (0, 0)),
                pl.BlockSpec((D2p, N3p), lambda i: (0, 0)),
                pl.BlockSpec((1, N3p), lambda i: (0, 0)),
            ],
            out_specs=pl.BlockSpec((tm, N3p), lambda i: (i, 0)),
        ),
        compiler_params=pltpu.CompilerParams(
            dimension_semantics=("parallel",),
            vmem_limit_bytes=32 * 1024 * 1024,
        ),
        cost_estimate=pl.CostEstimate(flops=flops, transcendentals=0,
                                      bytes_accessed=bytes_accessed),
    )(xp, w1p, b1p, w2p, b2p, w3p, b3p)
    return out[:M, :N3]


# ----------------------------------------------------------------------------
# Conv2d = NHWC im2col (glue, bf16) + Pallas matmul kernel (channels on lane axis).
# TODO(synk): a direct Pallas conv kernel (9-tap shifted-matmul accumulation in VMEM)
#             would avoid the 9x im2col HBM blowup entirely; left as bf16 im2col glue
#             since shapes here are toy.
# ----------------------------------------------------------------------------
def _im2col_nhwc(x, kh, kw, stride, padding):
    """x: (N, H, W, C) -> cols: (N*Ho*Wo, kh*kw*C), Ho, Wo."""
    n, h, w, c = x.shape
    xp = jnp.pad(x, ((0, 0), (padding, padding), (padding, padding), (0, 0)))
    ho = (h + 2 * padding - kh) // stride + 1
    wo = (w + 2 * padding - kw) // stride + 1
    patches = []
    for i in range(kh):
        for j in range(kw):
            patches.append(xp[:, i:i + ho * stride:stride, j:j + wo * stride:stride, :])
    cols = jnp.concatenate(patches, axis=-1)            # (N, Ho, Wo, kh*kw*C)
    return cols.reshape(n * ho * wo, kh * kw * c), ho, wo


def conv2d_nhwc(x, weight, bias, stride=1, padding=1, activation="none",
                out_dtype=jnp.bfloat16):
    """x: (N, H, W, Cin); weight: (Cout, Cin, kh, kw) (PyTorch layout) -> (N, Ho, Wo, Cout)."""
    n = x.shape[0]
    cout, cin, kh, kw = weight.shape
    cols, ho, wo = _im2col_nhwc(x.astype(jnp.bfloat16), kh, kw, stride, padding)
    w2 = weight.transpose(2, 3, 1, 0).reshape(kh * kw * cin, cout)  # matches cols K order
    out = pallas_linear(cols, w2, bias, activation, out_dtype=out_dtype)  # (N*Ho*Wo, Cout)
    return out.reshape(n, ho, wo, cout)


# ----------------------------------------------------------------------------
# Parameter construction (deterministic, synthetic "checkpoint").
# ----------------------------------------------------------------------------
def _init_conv(key, cout, cin, k):
    fan_in = cin * k * k
    kw_, kb_ = jax.random.split(key)
    w = jax.random.normal(kw_, (cout, cin, k, k), jnp.float32) / jnp.sqrt(fan_in)
    b = 0.01 * jax.random.normal(kb_, (cout,), jnp.float32)
    return w, b


def _init_fc(key, din, dout):
    kw_, kb_ = jax.random.split(key)
    w = jax.random.normal(kw_, (din, dout), jnp.float32) / jnp.sqrt(din)
    b = 0.01 * jax.random.normal(kb_, (dout,), jnp.float32)
    return w, b


def build_params(key, c_in=3, backbone_ch=(16, 32), num_anchors=3,
                 pool_size=4, fc_dim=128, num_classes=6):
    ks = jax.random.split(key, 10)
    p = {}
    p["bb_conv1"] = _init_conv(ks[0], backbone_ch[0], c_in, 3)
    p["bb_conv2"] = _init_conv(ks[1], backbone_ch[1], backbone_ch[0], 3)
    out_ch = backbone_ch[1]
    p["rpn_conv"] = _init_conv(ks[2], out_ch, out_ch, 3)
    p["rpn_cls"] = _init_conv(ks[3], num_anchors, out_ch, 1)
    p["rpn_bbox"] = _init_conv(ks[4], 4 * num_anchors, out_ch, 1)
    p["fc1"] = _init_fc(ks[5], out_ch * pool_size * pool_size, fc_dim)
    p["fc2"] = _init_fc(ks[6], fc_dim, fc_dim)
    p["cls_score"] = _init_fc(ks[7], fc_dim, num_classes)
    p["bbox_pred"] = _init_fc(ks[8], fc_dim, 4 * num_classes)
    return p


# ----------------------------------------------------------------------------
# RPN anchors / decoding / proposal selection (glue).
# ----------------------------------------------------------------------------
_BBOX_XFORM_CLIP = math.log(1000.0 / 16.0)   # matches maskrcnn_benchmark


def make_anchors(hf, wf, stride, sizes):
    ys = (jnp.arange(hf, dtype=jnp.float32) + 0.5) * stride
    xs = (jnp.arange(wf, dtype=jnp.float32) + 0.5) * stride
    cy, cx = jnp.meshgrid(ys, xs, indexing="ij")             # (Hf, Wf)
    sizes = jnp.asarray(sizes, jnp.float32)                  # (A,)
    half = sizes[None, None, :] / 2.0                        # (1, 1, A)
    x1 = cx[..., None] - half
    y1 = cy[..., None] - half
    x2 = cx[..., None] + half
    y2 = cy[..., None] + half
    return jnp.stack([x1, y1, x2, y2], axis=-1)              # (Hf, Wf, A, 4)


def decode_boxes(anchors, deltas, img_size):
    """anchors, deltas: (..., 4); standard (dx, dy, dw, dh) parameterization."""
    wa = anchors[..., 2] - anchors[..., 0]
    ha = anchors[..., 3] - anchors[..., 1]
    cxa = anchors[..., 0] + 0.5 * wa
    cya = anchors[..., 1] + 0.5 * ha
    dx, dy, dw, dh = (deltas[..., 0], deltas[..., 1],
                      jnp.clip(deltas[..., 2], -_BBOX_XFORM_CLIP, _BBOX_XFORM_CLIP),
                      jnp.clip(deltas[..., 3], -_BBOX_XFORM_CLIP, _BBOX_XFORM_CLIP))
    cx = dx * wa + cxa
    cy = dy * ha + cya
    w = jnp.exp(dw) * wa
    h = jnp.exp(dh) * ha
    x1 = jnp.clip(cx - 0.5 * w, 0.0, img_size - 1.0)
    y1 = jnp.clip(cy - 0.5 * h, 0.0, img_size - 1.0)
    x2 = jnp.clip(cx + 0.5 * w, 0.0, img_size - 1.0)
    y2 = jnp.clip(cy + 0.5 * h, 0.0, img_size - 1.0)
    x2 = jnp.maximum(x2, x1 + 1.0)
    y2 = jnp.maximum(y2, y1 + 1.0)
    return jnp.stack([x1, y1, x2, y2], axis=-1)


# ----------------------------------------------------------------------------
# ROIAlign as an MXU matmul: build a separable bilinear (hat) interpolation matrix
# per box and contract it with the flattened feature map.  No fancy-index gathers.
# TODO(synk): full ROIAlign sampling_ratio sub-bin averaging / aligned=-0.5 offset are
#             simplified to one bilinear sample per bin (same as before).
# ----------------------------------------------------------------------------
def roi_align(features, boxes, spatial_scale, out_size):
    """features: (N, Hf, Wf, C); boxes: (N, K, 4) image coords -> (N, K, S, S, C) f32."""
    n, hf, wf, c = features.shape
    k = boxes.shape[1]
    s = out_size

    iy = jnp.arange(hf, dtype=jnp.float32)
    ix = jnp.arange(wf, dtype=jnp.float32)

    def interp_matrix(box):  # box: (4,) -> (S*S, Hf*Wf) bilinear weights
        x1, y1, x2, y2 = box * spatial_scale
        ys = y1 + (jnp.arange(s, dtype=jnp.float32) + 0.5) * (y2 - y1) / s
        xs = x1 + (jnp.arange(s, dtype=jnp.float32) + 0.5) * (x2 - x1) / s
        yy, xx = jnp.meshgrid(ys, xs, indexing="ij")
        yy = jnp.clip(yy.reshape(-1), 0.0, hf - 1.0)          # (S*S,)
        xx = jnp.clip(xx.reshape(-1), 0.0, wf - 1.0)
        # separable triangle (hat) weights == bilinear interpolation
        wy = jnp.maximum(0.0, 1.0 - jnp.abs(iy[None, :] - yy[:, None]))   # (S*S, Hf)
        wx = jnp.maximum(0.0, 1.0 - jnp.abs(ix[None, :] - xx[:, None]))   # (S*S, Wf)
        return (wy[:, :, None] * wx[:, None, :]).reshape(s * s, hf * wf)

    interp = jax.vmap(jax.vmap(interp_matrix))(boxes)          # (N, K, S*S, Hf*Wf)
    interp = interp.reshape(n, k * s * s, hf * wf).astype(jnp.bfloat16)
    feats_flat = features.reshape(n, hf * wf, c).astype(jnp.bfloat16)
    pooled = jnp.einsum("npq,nqc->npc", interp, feats_flat,
                        preferred_element_type=jnp.float32)    # (N, K*S*S, C)
    return pooled.reshape(n, k, s, s, c)


# ----------------------------------------------------------------------------
# GeneralizedRCNN forward (inference path): backbone -> rpn -> roi_heads.
# ----------------------------------------------------------------------------
def generalized_rcnn_forward(params, images, *, num_anchors=3, anchor_sizes=(8, 16, 24),
                             top_k=16, pool_size=4, num_classes=6):
    n, _, h, w = images.shape
    x_nhwc = images.transpose(0, 2, 3, 1)                                # NCHW -> NHWC once

    # ---- backbone (NHWC, bf16 internal) ----
    f1 = conv2d_nhwc(x_nhwc, *params["bb_conv1"], stride=2, padding=1, activation="relu")
    feats = conv2d_nhwc(f1, *params["bb_conv2"], stride=2, padding=1, activation="relu")
    _, hf, wf, c_feat = feats.shape
    stride = h // hf

    # ---- RPN ----
    rpn_feat = conv2d_nhwc(feats, *params["rpn_conv"], stride=1, padding=1, activation="relu")
    flat = rpn_feat.reshape(n * hf * wf, c_feat)                         # channels already last

    # fused 1x1 heads: objectness (A) + bbox deltas (4A) in one lane-dense matmul
    cls_w, cls_b = params["rpn_cls"]
    bbox_w, bbox_b = params["rpn_bbox"]
    rpn_w = jnp.concatenate([cls_w.reshape(num_anchors, c_feat),
                             bbox_w.reshape(4 * num_anchors, c_feat)], axis=0).T  # (C, 5A)
    rpn_b = jnp.concatenate([cls_b, bbox_b])
    rpn_out = pallas_linear(flat, rpn_w, rpn_b, activation="none",
                            out_dtype=jnp.float32)                       # (N*Hf*Wf, 5A)
    objectness = jax.nn.sigmoid(rpn_out[:, :num_anchors])                # (N*Hf*Wf, A)
    rpn_deltas = rpn_out[:, num_anchors:]                                # (N*Hf*Wf, 4A)

    objectness = objectness.reshape(n, hf, wf, num_anchors)
    rpn_deltas = rpn_deltas.reshape(n, hf, wf, num_anchors, 4)

    anchors = make_anchors(hf, wf, stride, anchor_sizes)                 # (Hf, Wf, A, 4)
    prop_boxes = decode_boxes(anchors[None], rpn_deltas, float(h))       # (N, Hf, Wf, A, 4)

    obj_flat = objectness.reshape(n, -1)                                 # (N, Hf*Wf*A)
    box_flat = prop_boxes.reshape(n, -1, 4)
    topv, topi = jax.lax.top_k(obj_flat, top_k)                          # (N, K)
    proposals = jnp.take_along_axis(box_flat, topi[..., None], axis=1)   # (N, K, 4)

    # ---- ROI heads (box head): ROIAlign-as-matmul + ONE fused Pallas kernel ----
    pooled = roi_align(feats, proposals, 1.0 / stride, pool_size)        # (N, K, S, S, C)
    # NOTE: flatten order is (S, S, C); a real maskrcnn_benchmark checkpoint expects
    # PyTorch's (C, S, S) order -- harmless with synthetic random weights.
    pooled_flat = pooled.reshape(n * top_k, pool_size * pool_size * c_feat)

    cls_w, cls_b = params["cls_score"]
    box_w, box_b = params["bbox_pred"]
    head_w = jnp.concatenate([cls_w, box_w], axis=1)                     # (fc_dim, 5*C_cls)
    head_b = jnp.concatenate([cls_b, box_b])
    head_out = pallas_roi_box_head(pooled_flat,
                                   *params["fc1"], *params["fc2"],
                                   head_w, head_b)                       # (N*K, 5*C_cls)
    class_logits = head_out[:, :num_classes]
    box_regression = head_out[:, num_classes:]

    class_prob = jax.nn.softmax(class_logits, axis=-1).reshape(n, top_k, num_classes)
    labels = jnp.argmax(class_prob, axis=-1)                             # (N, K)
    scores = jnp.max(class_prob, axis=-1)                                # (N, K)

    box_regression = box_regression.reshape(n, top_k, num_classes, 4)
    sel_deltas = jnp.take_along_axis(box_regression, labels[..., None, None], axis=2)[:, :, 0]
    det_boxes = decode_boxes(proposals, sel_deltas, float(h))            # (N, K, 4)

    result = {
        "boxes": det_boxes,
        "scores": scores,
        "labels": labels,
        "objectness": topv,
        "proposals": proposals,
    }
    features = feats.astype(jnp.float32).transpose(0, 3, 1, 2)           # NCHW, f32 return
    # eval-mode GeneralizedRCNN returns (result, features, results_background);
    # results_background is omitted here (no background-only head in this synthetic model).
    return result, features


if __name__ == "__main__":
    key = jax.random.PRNGKey(0)
    k_img, k_par = jax.random.split(key)

    # images: NCHW, batch=2, 3 channels, 32x32
    images = jax.random.normal(k_img, (2, 3, 32, 32), jnp.float32)
    params = build_params(k_par)

    fwd = jax.jit(functools.partial(generalized_rcnn_forward, params))
    result, features = fwd(images)
    jax.block_until_ready((result, features))

    assert features.shape == (2, 32, 8, 8)
    assert result["boxes"].shape == (2, 16, 4)
    assert result["scores"].shape == (2, 16)
    print("KERNEL_OK")
</pallas_src>

<mosaic_0001>
module attributes {stable_mosaic.version = 11 : i64} {
  func.func @_matmul_bias_act_kernel(%arg0: i32, %arg1: i32, %arg2: i32, %arg3: memref<256x32xbf16, #tpu.memory_space<vmem>>, %arg4: memref<32x128xbf16, #tpu.memory_space<vmem>>, %arg5: memref<1x128xf32, #tpu.memory_space<vmem>>, %arg6: memref<256x128xbf16, #tpu.memory_space<vmem>>, %arg7: memref<256x128xf32, #tpu.memory_space<vmem>>) attributes {dimension_semantics = [#tpu.dimension_semantics<parallel>, #tpu.dimension_semantics<parallel>, #tpu.dimension_semantics<arbitrary>], iteration_bounds = array<i64: 2, 1, 1>, scalar_prefetch = 0 : i64, scratch_operands = 1 : i64, tpu.core_type = #tpu.core_type<tc>, window_params = [{transform_indices = @transform_0, window_bounds = array<i64: 256, 32>}, {transform_indices = @transform_1, window_bounds = array<i64: 32, 128>}, {transform_indices = @transform_2, window_bounds = array<i64: 1, 128>}, {transform_indices = @transform_3, window_bounds = array<i64: 256, 128>}]} {
    %c0_i32 = arith.constant 0 : i32
    %0 = arith.cmpi eq, %arg2, %c0_i32 : i32
    %1 = arith.extui %0 : i1 to i32
    %c0_i32_0 = arith.constant 0 : i32
    %2 = arith.cmpi ne, %1, %c0_i32_0 : i32
    scf.if %2 {
      %cst_10 = arith.constant 0.000000e+00 : f32
      %12 = vector.broadcast %cst_10 : f32 to vector<256x128xf32>
      %c0_11 = arith.constant 0 : index
      %c0_12 = arith.constant 0 : index
      %13 = vector.load %arg7[%c0_11, %c0_12] : memref<256x128xf32, #tpu.memory_space<vmem>>, vector<256x128xf32>
      tpu.vector_store %arg7[%c0_11, %c0_12], %12 {strides = array<i32>} : memref<256x128xf32, #tpu.memory_space<vmem>>, vector<256x128xf32>,
    } else {
    }
    %c0 = arith.constant 0 : index
    %c0_1 = arith.constant 0 : index
    %3 = vector.load %arg7[%c0, %c0_1] : memref<256x128xf32, #tpu.memory_space<vmem>>, vector<256x128xf32>
    %c0_2 = arith.constant 0 : index
    %c0_3 = arith.constant 0 : index
    %4 = vector.load %arg3[%c0_2, %c0_3] : memref<256x32xbf16, #tpu.memory_space<vmem>>, vector<256x32xbf16>
    %c0_4 = arith.constant 0 : index
    %c0_5 = arith.constant 0 : index
    %5 = vector.load %arg4[%c0_4, %c0_5] : memref<32x128xbf16, #tpu.memory_space<vmem>>, vector<32x128xbf16>
    %cst = arith.constant dense<0.000000e+00> : vector<256x128xf32>
    %6 = tpu.matmul %4, %5, %cst {dimension_numbers = #tpu.dot_dimension_numbers<[1], [0], [0], [1], [0, 0, 1, 1], [], []>} : vector<256x32xbf16>, vector<32x128xbf16>, vector<256x128xf32> -> vector<256x128xf32>
    %7 = arith.addf %3, %6 : vector<256x128xf32>
    %c0_6 = arith.constant 0 : index
    %c0_7 = arith.constant 0 : index
    %8 = vector.load %arg7[%c0_6, %c0_7] : memref<256x128xf32, #tpu.memory_space<vmem>>, vector<256x128xf32>
    tpu.vector_store %arg7[%c0_6, %c0_7], %7 {strides = array<i32>} : memref<256x128xf32, #tpu.memory_space<vmem>>, vector<256x128xf32>,
    %c0_i32_8 = arith.constant 0 : i32
    %9 = arith.cmpi eq, %arg2, %c0_i32_8 : i32
    %10 = arith.extui %9 : i1 to i32
    %c0_i32_9 = arith.constant 0 : i32
    %11 = arith.cmpi ne, %10, %c0_i32_9 : i32
    scf.if %11 {
      %c0_10 = arith.constant 0 : index
      %c0_11 = arith.constant 0 : index
      %12 = vector.load %arg7[%c0_10, %c0_11] : memref<256x128xf32, #tpu.memory_space<vmem>>, vector<256x128xf32>
      %c0_12 = arith.constant 0 : index
      %c0_13 = arith.constant 0 : index
      %13 = vector.load %arg5[%c0_12, %c0_13] : memref<1x128xf32, #tpu.memory_space<vmem>>, vector<1x128xf32>
      %14 = vector.broadcast %13 : vector<1x128xf32> to vector<256x128xf32>
      %15 = arith.addf %12, %14 : vector<256x128xf32>
      %cst_14 = arith.constant 0.000000e+00 : f32
      %16 = vector.broadcast %cst_14 : f32 to vector<256x128xf32>
      %17 = arith.maximumf %15, %16 : vector<256x128xf32>
      %18 = arith.truncf %17 : vector<256x128xf32> to vector<256x128xbf16>
      %c0_15 = arith.constant 0 : index
      %c0_16 = arith.constant 0 : index
      %19 = vector.load %arg6[%c0_15, %c0_16] : memref<256x128xbf16, #tpu.memory_space<vmem>>, vector<256x128xbf16>
      tpu.vector_store %arg6[%c0_15, %c0_16], %18 {strides = array<i32>} : memref<256x128xbf16, #tpu.memory_space<vmem>>, vector<256x128xbf16>,
    } else {
    }
    return
  }
  func.func @transform_0(%arg0: i32, %arg1: i32, %arg2: i32) -> (i32, i32) {
    %c0_i32 = arith.constant 0 : i32
    return %arg0, %arg2 : i32, i32
  }
  func.func @transform_1(%arg0: i32, %arg1: i32, %arg2: i32) -> (i32, i32) {
    %c0_i32 = arith.constant 0 : i32
    return %arg2, %arg1 : i32, i32
  }
  func.func @transform_2(%arg0: i32, %arg1: i32, %arg2: i32) -> (i32, i32) {
    %c0_i32 = arith.constant 0 : i32
    %c0_i32_0 = arith.constant 0 : i32
    return %c0_i32, %arg1 : i32, i32
  }
  func.func @transform_3(%arg0: i32, %arg1: i32, %arg2: i32) -> (i32, i32) {
    %c0_i32 = arith.constant 0 : i32
    return %arg0, %arg1 : i32, i32
  }
}

module attributes {stable_mosaic.version = 11 : i64} {
  func.func @_matmul_bias_act_kernel(%arg0: i32, %arg1: i32, %arg2: i32, %arg3: memref<64x256xbf16, #tpu.memory_space<vmem>>, %arg4: memref<256x128xbf16, #tpu.memory_space<vmem>>, %arg5: memref<1x128xf32, #tpu.memory_space<vmem>>, %arg6: memref<64x128xbf16, #tpu.memory_space<vmem>>, %arg7: memref<64x128xf32, #tpu.memory_space<vmem>>) attributes {dimension_semantics = [#tpu.dimension_semantics<parallel>, #tpu.dimension_semantics<parallel>, #tpu.dimension_semantics<arbitrary>], iteration_bounds = array<i64: 2, 1, 1>, scalar_prefetch = 0 : i64, scratch_operands = 1 : i64, tpu.core_type = #tpu.core_type<tc>, window_params = [{transform_indices = @transform_0, window_bounds = array<i64: 64, 256>}, {transform_indices = @transform_1, window_bounds = array<i64: 256, 128>}, {transform_indices = @transform_2, window_bounds = array<i64: 1, 128>}, {transform_indices = @transform_3, window_bounds = array<i64: 64, 128>}]} {
    %c0_i32 = arith.constant 0 : i32
    %0 = arith.cmpi eq, %arg2, %c0_i32 : i32
    %1 = arith.extui %0 : i1 to i32
    %c0_i32_0 = arith.constant 0 : i32
    %2 = arith.cmpi ne, %1, %c0_i32_0 : i32
    scf.if %2 {
      %cst_10 = arith.constant 0.000000e+00 : f32
      %12 = vector.broadcast %cst_10 : f32 to vector<64x128xf32>
      %c0_11 = arith.constant 0 : index
      %c0_12 = arith.constant 0 : index
      %13 = vector.load %arg7[%c0_11, %c0_12] : memref<64x128xf32, #tpu.memory_space<vmem>>, vector<64x128xf32>
      tpu.vector_store %arg7[%c0_11, %c0_12], %12 {strides = array<i32>} : memref<64x128xf32, #tpu.memory_space<vmem>>, vector<64x128xf32>,
    } else {
    }
    %c0 = arith.constant 0 : index
    %c0_1 = arith.constant 0 : index
    %3 = vector.load %arg7[%c0, %c0_1] : memref<64x128xf32, #tpu.memory_space<vmem>>, vector<64x128xf32>
    %c0_2 = arith.constant 0 : index
    %c0_3 = arith.constant 0 : index
    %4 = vector.load %arg3[%c0_2, %c0_3] : memref<64x256xbf16, #tpu.memory_space<vmem>>, vector<64x256xbf16>
    %c0_4 = arith.constant 0 : index
    %c0_5 = arith.constant 0 : index
    %5 = vector.load %arg4[%c0_4, %c0_5] : memref<256x128xbf16, #tpu.memory_space<vmem>>, vector<256x128xbf16>
    %cst = arith.constant dense<0.000000e+00> : vector<64x128xf32>
    %6 = tpu.matmul %4, %5, %cst {dimension_numbers = #tpu.dot_dimension_numbers<[1], [0], [0], [1], [0, 0, 1, 1], [], []>} : vector<64x256xbf16>, vector<256x128xbf16>, vector<64x128xf32> -> vector<64x128xf32>
    %7 = arith.addf %3, %6 : vector<64x128xf32>
    %c0_6 = arith.constant 0 : index
    %c0_7 = arith.constant 0 : index
    %8 = vector.load %arg7[%c0_6, %c0_7] : memref<64x128xf32, #tpu.memory_space<vmem>>, vector<64x128xf32>
    tpu.vector_store %arg7[%c0_6, %c0_7], %7 {strides = array<i32>} : memref<64x128xf32, #tpu.memory_space<vmem>>, vector<64x128xf32>,
    %c0_i32_8 = arith.constant 0 : i32
    %9 = arith.cmpi eq, %arg2, %c0_i32_8 : i32
    %10 = arith.extui %9 : i1 to i32
    %c0_i32_9 = arith.constant 0 : i32
    %11 = arith.cmpi ne, %10, %c0_i32_9 : i32
    scf.if %11 {
      %c0_10 = arith.constant 0 : index
      %c0_11 = arith.constant 0 : index
      %12 = vector.load %arg7[%c0_10, %c0_11] : memref<64x128xf32, #tpu.memory_space<vmem>>, vector<64x128xf32>
      %c0_12 = arith.constant 0 : index
      %c0_13 = arith.constant 0 : index
      %13 = vector.load %arg5[%c0_12, %c0_13] : memref<1x128xf32, #tpu.memory_space<vmem>>, vector<1x128xf32>
      %14 = vector.broadcast %13 : vector<1x128xf32> to vector<64x128xf32>
      %15 = arith.addf %12, %14 : vector<64x128xf32>
      %cst_14 = arith.constant 0.000000e+00 : f32
      %16 = vector.broadcast %cst_14 : f32 to vector<64x128xf32>
      %17 = arith.maximumf %15, %16 : vector<64x128xf32>
      %18 = arith.truncf %17 : vector<64x128xf32> to vector<64x128xbf16>
      %c0_15 = arith.constant 0 : index
      %c0_16 = arith.constant 0 : index
      %19 = vector.load %arg6[%c0_15, %c0_16] : memref<64x128xbf16, #tpu.memory_space<vmem>>, vector<64x128xbf16>
      tpu.vector_store %arg6[%c0_15, %c0_16], %18 {strides = array<i32>} : memref<64x128xbf16, #tpu.memory_space<vmem>>, vector<64x128xbf16>,
    } else {
    }
    return
  }
  func.func @transform_0(%arg0: i32, %arg1: i32, %arg2: i32) -> (i32, i32) {
    %c0_i32 = arith.constant 0 : i32
    return %arg0, %arg2 : i32, i32
  }
  func.func @transform_1(%arg0: i32, %arg1: i32, %arg2: i32) -> (i32, i32) {
    %c0_i32 = arith.constant 0 : i32
    return %arg2, %arg1 : i32, i32
  }
  func.func @transform_2(%arg0: i32, %arg1: i32, %arg2: i32) -> (i32, i32) {
    %c0_i32 = arith.constant 0 : i32
    %c0_i32_0 = arith.constant 0 : i32
    return %c0_i32, %arg1 : i32, i32
  }
  func.func @transform_3(%arg0: i32, %arg1: i32, %arg2: i32) -> (i32, i32) {
    %c0_i32 = arith.constant 0 : i32
    return %arg0, %arg1 : i32, i32
  }
}

module attributes {stable_mosaic.version = 11 : i64} {
  func.func @_matmul_bias_act_kernel(%arg0: i32, %arg1: i32, %arg2: i32, %arg3: memref<64x32xbf16, #tpu.memory_space<vmem>>, %arg4: memref<32x128xbf16, #tpu.memory_space<vmem>>, %arg5: memref<1x128xf32, #tpu.memory_space<vmem>>, %arg6: memref<64x128xf32, #tpu.memory_space<vmem>>, %arg7: memref<64x128xf32, #tpu.memory_space<vmem>>) attributes {dimension_semantics = [#tpu.dimension_semantics<parallel>, #tpu.dimension_semantics<parallel>, #tpu.dimension_semantics<arbitrary>], iteration_bounds = array<i64: 2, 1, 1>, scalar_prefetch = 0 : i64, scratch_operands = 1 : i64, tpu.core_type = #tpu.core_type<tc>, window_params = [{transform_indices = @transform_0, window_bounds = array<i64: 64, 32>}, {transform_indices = @transform_1, window_bounds = array<i64: 32, 128>}, {transform_indices = @transform_2, window_bounds = array<i64: 1, 128>}, {transform_indices = @transform_3, window_bounds = array<i64: 64, 128>}]} {
    %c0_i32 = arith.constant 0 : i32
    %0 = arith.cmpi eq, %arg2, %c0_i32 : i32
    %1 = arith.extui %0 : i1 to i32
    %c0_i32_0 = arith.constant 0 : i32
    %2 = arith.cmpi ne, %1, %c0_i32_0 : i32
    scf.if %2 {
      %cst_10 = arith.constant 0.000000e+00 : f32
      %12 = vector.broadcast %cst_10 : f32 to vector<64x128xf32>
      %c0_11 = arith.constant 0 : index
      %c0_12 = arith.constant 0 : index
      %13 = vector.load %arg7[%c0_11, %c0_12] : memref<64x128xf32, #tpu.memory_space<vmem>>, vector<64x128xf32>
      tpu.vector_store %arg7[%c0_11, %c0_12], %12 {strides = array<i32>} : memref<64x128xf32, #tpu.memory_space<vmem>>, vector<64x128xf32>,
    } else {
    }
    %c0 = arith.constant 0 : index
    %c0_1 = arith.constant 0 : index
    %3 = vector.load %arg7[%c0, %c0_1] : memref<64x128xf32, #tpu.memory_space<vmem>>, vector<64x128xf32>
    %c0_2 = arith.constant 0 : index
    %c0_3 = arith.constant 0 : index
    %4 = vector.load %arg3[%c0_2, %c0_3] : memref<64x32xbf16, #tpu.memory_space<vmem>>, vector<64x32xbf16>
    %c0_4 = arith.constant 0 : index
    %c0_5 = arith.constant 0 : index
    %5 = vector.load %arg4[%c0_4, %c0_5] : memref<32x128xbf16, #tpu.memory_space<vmem>>, vector<32x128xbf16>
    %cst = arith.constant dense<0.000000e+00> : vector<64x128xf32>
    %6 = tpu.matmul %4, %5, %cst {dimension_numbers = #tpu.dot_dimension_numbers<[1], [0], [0], [1], [0, 0, 1, 1], [], []>} : vector<64x32xbf16>, vector<32x128xbf16>, vector<64x128xf32> -> vector<64x128xf32>
    %7 = arith.addf %3, %6 : vector<64x128xf32>
    %c0_6 = arith.constant 0 : index
    %c0_7 = arith.constant 0 : index
    %8 = vector.load %arg7[%c0_6, %c0_7] : memref<64x128xf32, #tpu.memory_space<vmem>>, vector<64x128xf32>
    tpu.vector_store %arg7[%c0_6, %c0_7], %7 {strides = array<i32>} : memref<64x128xf32, #tpu.memory_space<vmem>>, vector<64x128xf32>,
    %c0_i32_8 = arith.constant 0 : i32
    %9 = arith.cmpi eq, %arg2, %c0_i32_8 : i32
    %10 = arith.extui %9 : i1 to i32
    %c0_i32_9 = arith.constant 0 : i32
    %11 = arith.cmpi ne, %10, %c0_i32_9 : i32
    scf.if %11 {
      %c0_10 = arith.constant 0 : index
      %c0_11 = arith.constant 0 : index
      %12 = vector.load %arg7[%c0_10, %c0_11] : memref<64x128xf32, #tpu.memory_space<vmem>>, vector<64x128xf32>
      %c0_12 = arith.constant 0 : index
      %c0_13 = arith.constant 0 : index
      %13 = vector.load %arg5[%c0_12, %c0_13] : memref<1x128xf32, #tpu.memory_space<vmem>>, vector<1x128xf32>
      %14 = vector.broadcast %13 : vector<1x128xf32> to vector<64x128xf32>
      %15 = arith.addf %12, %14 : vector<64x128xf32>
      %c0_14 = arith.constant 0 : index
      %c0_15 = arith.constant 0 : index
      %16 = vector.load %arg6[%c0_14, %c0_15] : memref<64x128xf32, #tpu.memory_space<vmem>>, vector<64x128xf32>
      tpu.vector_store %arg6[%c0_14, %c0_15], %15 {strides = array<i32>} : memref<64x128xf32, #tpu.memory_space<vmem>>, vector<64x128xf32>,
    } else {
    }
    return
  }
  func.func @transform_0(%arg0: i32, %arg1: i32, %arg2: i32) -> (i32, i32) {
    %c0_i32 = arith.constant 0 : i32
    return %arg0, %arg2 : i32, i32
  }
  func.func @transform_1(%arg0: i32, %arg1: i32, %arg2: i32) -> (i32, i32) {
    %c0_i32 = arith.constant 0 : i32
    return %arg2, %arg1 : i32, i32
  }
  func.func @transform_2(%arg0: i32, %arg1: i32, %arg2: i32) -> (i32, i32) {
    %c0_i32 = arith.constant 0 : i32
    %c0_i32_0 = arith.constant 0 : i32
    return %c0_i32, %arg1 : i32, i32
  }
  func.func @transform_3(%arg0: i32, %arg1: i32, %arg2: i32) -> (i32, i32) {
    %c0_i32 = arith.constant 0 : i32
    return %arg0, %arg1 : i32, i32
  }
}

module attributes {stable_mosaic.version = 11 : i64} {
  func.func @_matmul_bias_act_kernel(%arg0: i32, %arg1: i32, %arg2: i32, %arg3: memref<64x512xbf16, #tpu.memory_space<vmem>>, %arg4: memref<512x128xbf16, #tpu.memory_space<vmem>>, %arg5: memref<1x128xf32, #tpu.memory_space<vmem>>, %arg6: memref<64x128xbf16, #tpu.memory_space<vmem>>, %arg7: memref<64x128xf32, #tpu.memory_space<vmem>>) attributes {dimension_semantics = [#tpu.dimension_semantics<parallel>, #tpu.dimension_semantics<parallel>, #tpu.dimension_semantics<arbitrary>], iteration_bounds = array<i64: 2, 1, 1>, scalar_prefetch = 0 : i64, scratch_operands = 1 : i64, tpu.core_type = #tpu.core_type<tc>, window_params = [{transform_indices = @transform_0, window_bounds = array<i64: 64, 512>}, {transform_indices = @transform_1, window_bounds = array<i64: 512, 128>}, {transform_indices = @transform_2, window_bounds = array<i64: 1, 128>}, {transform_indices = @transform_3, window_bounds = array<i64: 64, 128>}]} {
    %c0_i32 = arith.constant 0 : i32
    %0 = arith.cmpi eq, %arg2, %c0_i32 : i32
    %1 = arith.extui %0 : i1 to i32
    %c0_i32_0 = arith.constant 0 : i32
    %2 = arith.cmpi ne, %1, %c0_i32_0 : i32
    scf.if %2 {
      %cst_10 = arith.constant 0.000000e+00 : f32
      %12 = vector.broadcast %cst_10 : f32 to vector<64x128xf32>
      %c0_11 = arith.constant 0 : index
      %c0_12 = arith.constant 0 : index
      %13 = vector.load %arg7[%c0_11, %c0_12] : memref<64x128xf32, #tpu.memory_space<vmem>>, vector<64x128xf32>
      tpu.vector_store %arg7[%c0_11, %c0_12], %12 {strides = array<i32>} : memref<64x128xf32, #tpu.memory_space<vmem>>, vector<64x128xf32>,
    } else {
    }
    %c0 = arith.constant 0 : index
    %c0_1 = arith.constant 0 : index
    %3 = vector.load %arg7[%c0, %c0_1] : memref<64x128xf32, #tpu.memory_space<vmem>>, vector<64x128xf32>
    %c0_2 = arith.constant 0 : index
    %c0_3 = arith.constant 0 : index
    %4 = vector.load %arg3[%c0_2, %c0_3] : memref<64x512xbf16, #tpu.memory_space<vmem>>, vector<64x512xbf16>
    %c0_4 = arith.constant 0 : index
    %c0_5 = arith.constant 0 : index
    %5 = vector.load %arg4[%c0_4, %c0_5] : memref<512x128xbf16, #tpu.memory_space<vmem>>, vector<512x128xbf16>
    %cst = arith.constant dense<0.000000e+00> : vector<64x128xf32>
    %6 = tpu.matmul %4, %5, %cst {dimension_numbers = #tpu.dot_dimension_numbers<[1], [0], [0], [1], [0, 0, 1, 1], [], []>} : vector<64x512xbf16>, vector<512x128xbf16>, vector<64x128xf32> -> vector<64x128xf32>
    %7 = arith.addf %3, %6 : vector<64x128xf32>
    %c0_6 = arith.constant 0 : index
    %c0_7 = arith.constant 0 : index
    %8 = vector.load %arg7[%c0_6, %c0_7] : memref<64x128xf32, #tpu.memory_space<vmem>>, vector<64x128xf32>
    tpu.vector_store %arg7[%c0_6, %c0_7], %7 {strides = array<i32>} : memref<64x128xf32, #tpu.memory_space<vmem>>, vector<64x128xf32>,
    %c0_i32_8 = arith.constant 0 : i32
    %9 = arith.cmpi eq, %arg2, %c0_i32_8 : i32
    %10 = arith.extui %9 : i1 to i32
    %c0_i32_9 = arith.constant 0 : i32
    %11 = arith.cmpi ne, %10, %c0_i32_9 : i32
    scf.if %11 {
      %c0_10 = arith.constant 0 : index
      %c0_11 = arith.constant 0 : index
      %12 = vector.load %arg7[%c0_10, %c0_11] : memref<64x128xf32, #tpu.memory_space<vmem>>, vector<64x128xf32>
      %c0_12 = arith.constant 0 : index
      %c0_13 = arith.constant 0 : index
      %13 = vector.load %arg5[%c0_12, %c0_13] : memref<1x128xf32, #tpu.memory_space<vmem>>, vector<1x128xf32>
      %14 = vector.broadcast %13 : vector<1x128xf32> to vector<64x128xf32>
      %15 = arith.addf %12, %14 : vector<64x128xf32>
      %cst_14 = arith.constant 0.000000e+00 : f32
      %16 = vector.broadcast %cst_14 : f32 to vector<64x128xf32>
      %17 = arith.maximumf %15, %16 : vector<64x128xf32>
      %18 = arith.truncf %17 : vector<64x128xf32> to vector<64x128xbf16>
      %c0_15 = arith.constant 0 : index
      %c0_16 = arith.constant 0 : index
      %19 = vector.load %arg6[%c0_15, %c0_16] : memref<64x128xbf16, #tpu.memory_space<vmem>>, vector<64x128xbf16>
      tpu.vector_store %arg6[%c0_15, %c0_16], %18 {strides = array<i32>} : memref<64x128xbf16, #tpu.memory_space<vmem>>, vector<64x128xbf16>,
    } else {
    }
    return
  }
  func.func @transform_0(%arg0: i32, %arg1: i32, %arg2: i32) -> (i32, i32) {
    %c0_i32 = arith.constant 0 : i32
    return %arg0, %arg2 : i32, i32
  }
  func.func @transform_1(%arg0: i32, %arg1: i32, %arg2: i32) -> (i32, i32) {
    %c0_i32 = arith.constant 0 : i32
    return %arg2, %arg1 : i32, i32
  }
  func.func @transform_2(%arg0: i32, %arg1: i32, %arg2: i32) -> (i32, i32) {
    %c0_i32 = arith.constant 0 : i32
    %c0_i32_0 = arith.constant 0 : i32
    return %c0_i32, %arg1 : i32, i32
  }
  func.func @transform_3(%arg0: i32, %arg1: i32, %arg2: i32) -> (i32, i32) {
    %c0_i32 = arith.constant 0 : i32
    return %arg0, %arg1 : i32, i32
  }
}

module attributes {stable_mosaic.version = 11 : i64} {
  func.func @_roi_box_head_kernel(%arg0: i32, %arg1: memref<16x512xbf16, #tpu.memory_space<vmem>>, %arg2: memref<512x128xbf16, #tpu.memory_space<vmem>>, %arg3: memref<1x128xf32, #tpu.memory_space<vmem>>, %arg4: memref<128x128xbf16, #tpu.memory_space<vmem>>, %arg5: memref<1x128xf32, #tpu.memory_space<vmem>>, %arg6: memref<128x128xbf16, #tpu.memory_space<vmem>>, %arg7: memref<1x128xf32, #tpu.memory_space<vmem>>, %arg8: memref<16x128xf32, #tpu.memory_space<vmem>>) attributes {dimension_semantics = [#tpu.dimension_semantics<parallel>], iteration_bounds = array<i64: 2>, scalar_prefetch = 0 : i64, scratch_operands = 0 : i64, tpu.core_type = #tpu.core_type<tc>, window_params = [{transform_indices = @transform_0, window_bounds = array<i64: 16, 512>}, {pipeline_mode = #tpu.pipeline_mode<synchronous>, transform_indices = @transform_1, window_bounds = array<i64: 512, 128>}, {pipeline_mode = #tpu.pipeline_mode<synchronous>, transform_indices = @transform_2, window_bounds = array<i64: 1, 128>}, {pipeline_mode = #tpu.pipeline_mode<synchronous>, transform_indices = @transform_3, window_bounds = array<i64: 128, 128>}, {pipeline_mode = #tpu.pipeline_mode<synchronous>, transform_indices = @transform_4, window_bounds = array<i64: 1, 128>}, {pipeline_mode = #tpu.pipeline_mode<synchronous>, transform_indices = @transform_5, window_bounds = array<i64: 128, 128>}, {pipeline_mode = #tpu.pipeline_mode<synchronous>, transform_indices = @transform_6, window_bounds = array<i64: 1, 128>}, {transform_indices = @transform_7, window_bounds = array<i64: 16, 128>}]} {
    %c0 = arith.constant 0 : index
    %c0_0 = arith.constant 0 : index
    %0 = vector.load %arg1[%c0, %c0_0] : memref<16x512xbf16, #tpu.memory_space<vmem>>, vector<16x512xbf16>
    %c0_1 = arith.constant 0 : index
    %c0_2 = arith.constant 0 : index
    %1 = vector.load %arg2[%c0_1, %c0_2] : memref<512x128xbf16, #tpu.memory_space<vmem>>, vector<512x128xbf16>
    %cst = arith.constant dense<0.000000e+00> : vector<16x128xf32>
    %2 = tpu.matmul %0, %1, %cst {dimension_numbers = #tpu.dot_dimension_numbers<[1], [0], [0], [1], [0, 0, 1, 1], [], []>} : vector<16x512xbf16>, vector<512x128xbf16>, vector<16x128xf32> -> vector<16x128xf32>
    %c0_3 = arith.constant 0 : index
    %c0_4 = arith.constant 0 : index
    %3 = vector.load %arg3[%c0_3, %c0_4] : memref<1x128xf32, #tpu.memory_space<vmem>>, vector<1x128xf32>
    %4 = vector.broadcast %3 : vector<1x128xf32> to vector<16x128xf32>
    %5 = arith.addf %2, %4 : vector<16x128xf32>
    %cst_5 = arith.constant 0.000000e+00 : f32
    %6 = vector.broadcast %cst_5 : f32 to vector<16x128xf32>
    %7 = arith.maximumf %5, %6 : vector<16x128xf32>
    %8 = arith.truncf %7 : vector<16x128xf32> to vector<16x128xbf16>
    %c0_6 = arith.constant 0 : index
    %c0_7 = arith.constant 0 : index
    %9 = vector.load %arg4[%c0_6, %c0_7] : memref<128x128xbf16, #tpu.memory_space<vmem>>, vector<128x128xbf16>
    %cst_8 = arith.constant dense<0.000000e+00> : vector<16x128xf32>
    %10 = tpu.matmul %8, %9, %cst_8 {dimension_numbers = #tpu.dot_dimension_numbers<[1], [0], [0], [1], [0, 0, 1, 1], [], []>} : vector<16x128xbf16>, vector<128x128xbf16>, vector<16x128xf32> -> vector<16x128xf32>
    %c0_9 = arith.constant 0 : index
    %c0_10 = arith.constant 0 : index
    %11 = vector.load %arg5[%c0_9, %c0_10] : memref<1x128xf32, #tpu.memory_space<vmem>>, vector<1x128xf32>
    %12 = vector.broadcast %11 : vector<1x128xf32> to vector<16x128xf32>
    %13 = arith.addf %10, %12 : vector<16x128xf32>
    %cst_11 = arith.constant 0.000000e+00 : f32
    %14 = vector.broadcast %cst_11 : f32 to vector<16x128xf32>
    %15 = arith.maximumf %13, %14 : vector<16x128xf32>
    %16 = arith.truncf %15 : vector<16x128xf32> to vector<16x128xbf16>
    %c0_12 = arith.constant 0 : index
    %c0_13 = arith.constant 0 : index
    %17 = vector.load %arg6[%c0_12, %c0_13] : memref<128x128xbf16, #tpu.memory_space<vmem>>, vector<128x128xbf16>
    %cst_14 = arith.constant dense<0.000000e+00> : vector<16x128xf32>
    %18 = tpu.matmul %16, %17, %cst_14 {dimension_numbers = #tpu.dot_dimension_numbers<[1], [0], [0], [1], [0, 0, 1, 1], [], []>} : vector<16x128xbf16>, vector<128x128xbf16>, vector<16x128xf32> -> vector<16x128xf32>
    %c0_15 = arith.constant 0 : index
    %c0_16 = arith.constant 0 : index
    %19 = vector.load %arg7[%c0_15, %c0_16] : memref<1x128xf32, #tpu.memory_space<vmem>>, vector<1x128xf32>
    %20 = vector.broadcast %19 : vector<1x128xf32> to vector<16x128xf32>
    %21 = arith.addf %18, %20 : vector<16x128xf32>
    %c0_17 = arith.constant 0 : index
    %c0_18 = arith.constant 0 : index
    %22 = vector.load %arg8[%c0_17, %c0_18] : memref<16x128xf32, #tpu.memory_space<vmem>>, vector<16x128xf32>
    tpu.vector_store %arg8[%c0_17, %c0_18], %21 {strides = array<i32>} : memref<16x128xf32, #tpu.memory_space<vmem>>, vector<16x128xf32>,
    return
  }
  func.func @transform_0(%arg0: i32) -> (i32, i32) {
    %c0_i32 = arith.constant 0 : i32
    %c0_i32_0 = arith.constant 0 : i32
    return %arg0, %c0_i32 : i32, i32
  }
  func.func @transform_1(%arg0: i32) -> (i32, i32) {
    %c0_i32 = arith.constant 0 : i32
    %c0_i32_0 = arith.constant 0 : i32
    %c0_i32_1 = arith.constant 0 : i32
    return %c0_i32, %c0_i32_0 : i32, i32
  }
  func.func @transform_2(%arg0: i32) -> (i32, i32) {
    %c0_i32 = arith.constant 0 : i32
    %c0_i32_0 = arith.constant 0 : i32
    %c0_i32_1 = arith.constant 0 : i32
    return %c0_i32, %c0_i32_0 : i32, i32
  }
  func.func @transform_3(%arg0: i32) -> (i32, i32) {
    %c0_i32 = arith.constant 0 : i32
    %c0_i32_0 = arith.constant 0 : i32
    %c0_i32_1 = arith.constant 0 : i32
    return %c0_i32, %c0_i32_0 : i32, i32
  }
  func.func @transform_4(%arg0: i32) -> (i32, i32) {
    %c0_i32 = arith.constant 0 : i32
    %c0_i32_0 = arith.constant 0 : i32
    %c0_i32_1 = arith.constant 0 : i32
    return %c0_i32, %c0_i32_0 : i32, i32
  }
  func.func @transform_5(%arg0: i32) -> (i32, i32) {
    %c0_i32 = arith.constant 0 : i32
    %c0_i32_0 = arith.constant 0 : i32
    %c0_i32_1 = arith.constant 0 : i32
    return %c0_i32, %c0_i32_0 : i32, i32
  }
  func.func @transform_6(%arg0: i32) -> (i32, i32) {
    %c0_i32 = arith.constant 0 : i32
    %c0_i32_0 = arith.constant 0 : i32
    %c0_i32_1 = arith.constant 0 : i32
    return %c0_i32, %c0_i32_0 : i32, i32
  }
  func.func @transform_7(%arg0: i32) -> (i32, i32) {
    %c0_i32 = arith.constant 0 : i32
    %c0_i32_0 = arith.constant 0 : i32
    return %arg0, %c0_i32 : i32, i32
  }
}

</mosaic_0001>

<bundles_post_ra>
// kernel: generalized_rcnn_forward.6
= control target key start
LH: loop header
LB: loop body
LE: loop exit
PB: predicated region body
PF: predicated region fallthrough
CT: control target
= control target key end

     0   :  { %s964_s12 = smov 0   ;;  %s966_s13 = smov 0   ;;  %s1062_s0 = inlined_call_operand.vmem [shape: bf16[128,256], index: 0, kind: input, shape index: {}]   ;;  %s1063_s1 = inlined_call_operand.vmem [shape: bf16[256,128], index: 1, kind: input, shape index: {}]   ;;  %s1064_s2 = inlined_call_operand.vmem [shape: f32[1,128], index: 2, kind: input, shape index: {}]   ;;  %s1065_s3 = inlined_call_operand.vmem [shape: bf16[128,128], index: 3, kind: output, shape index: {}]  }
   0x1   :  { %s968_s14 = smov 0  }
   0x2 LB: > { %s32_s15 = sadd.s32 1, %s938_s13  ;;  %p739_p0 = scmp.ge.s32.totalorder %s942_s14, 1  ;;  %s942_s14 = sphi %s968_s14, %s13_s14   ;;  %s938_s13 = sphi %s966_s13, %s1067_s13   ;;  %s934_s12 = sphi %s964_s12, %s1066_s12  }
   0x3   : > { %p34_p1 = scmp.ge.s32.totalorder %s32_s15, 2  ;;  %p191_p2 = scmp.lt.s32.totalorder %s942_s14, 3 }
   0x5   : > { %s1069_s15 = smov (%p34_p1, %s32_s15), 0  ;;  %p192_p3 = pnand %p739_p0, %p191_p2 }
   0x6   : > { %s740_s18 = sshll.u32 (!%p192_p3), %s934_s12, 3 }
   0x7   : > { %195 = sbr.rel (%p192_p3) target bundleno = 261 (0x105), region = 32  ;;  %p236_p4 = scmp.lt.s32.totalorder (!%p192_p3), %s740_s18, 15 }
   0xc   : > { %v892_v0 = vld [vmem:[%s1063_s1 + $0x78] sm:$0xff]   ;;  %v894_v2 = vld [vmem:[%s1063_s1 + $0x70] sm:$0xff]   ;;  %v896_v4 = vld [vmem:[%s1063_s1 + $0x68] sm:$0xff]   ;;  %s1071_s18 = smov (!%p236_p4, %s740_s18), 15 }
   0xd   : > { %v893_v1 = vld [vmem:[%s1063_s1 + $0x38] sm:$0xff]   ;;  %812 = vmatprep.subr.bf16.mxu0 %v892_v0  ;;  %852 = vmatprep.subr.bf16.mxu1 %v892_v0  ;;  %v895_v3 = vld [vmem:[%s1063_s1 + $0x30] sm:$0xff]   ;;  %v897_v5 = vld [vmem:[%s1063_s1 + $0x28] sm:$0xff]   ;;  %s780_s6 = sshll.u32 %s1071_s18, 3  ;;  %s744_s5 = sshll.u32 %s1071_s18, 2 }
   0xe   : > { %813 = vmatpush3.bf16.msra.mxu0 %v893_v1  ;;  %860 = vmatpush3.bf16.msra.mxu1 %v893_v1  ;;  %v898_v6 = vld [vmem:[%s1063_s1 + $0x60] sm:$0xff]   ;;  %v900_v8 = vld [vmem:[%s1063_s1 + $0x58] sm:$0xff]   ;;  %s1015_s11 = scalar_lea.vmem %s1062_s0, %s780_s6  ;;  %v902_v10 = vld [vmem:[%s1063_s1 + $0x50] sm:$0xff]   ;;  %s265_s8 = scalar_lea.vmem %s1065_s3, %s744_s5 }
   0xf   : > { %814 = vmatprep.subr.bf16.mxu0 %v894_v2  ;;  %853 = vmatprep.subr.bf16.mxu1 %v894_v2  ;;  %v899_v7 = vld [vmem:[%s1063_s1 + $0x20] sm:$0xff]   ;;  %v901_v9 = vld [vmem:[%s1063_s1 + $0x18] sm:$0xff]   ;;  %v903_v13 = vld [vmem:[%s1063_s1 + $0x10] sm:$0xff]  }
  0x10   : > { %v910_v11 = vld [vmem:[%s1015_s11 + $0x4] ss:$8 sps:$4 sm:$0xff]   ;;  %v908_v18 = vld [vmem:[%s1015_s11] ss:$8 sps:$4 sm:$0xff]   ;;  %v914_v20 = vld [vmem:[%s1015_s11 + $0x14] ss:$8 sps:$4 sm:$0xff]  }
  0x11   : > { %v913_v12 = vld [vmem:[%s1015_s11 + $0x24] ss:$8 sps:$4 sm:$0xff]   ;;  %496 = vmatprep.mubr.bf16.mxu0 %v910_v11  ;;  %v911_v19 = vld [vmem:[%s1015_s11 + $0x20] ss:$8 sps:$4 sm:$0xff]   ;;  %v916_v21 = vld [vmem:[%s1015_s11 + $0x34] ss:$8 sps:$4 sm:$0xff]  }
  0x12   : > { %815 = vmatpush3.bf16.msra.mxu0 %v895_v3  ;;  %861 = vmatpush3.bf16.msra.mxu1 %v895_v3  ;;  %v904_v14 = vld [vmem:[%s1063_s1 + $0x48] sm:$0xff]   ;;  %v906_v16 = vld [vmem:[%s1063_s1 + $0x40] sm:$0xff]   ;;  %v918_v22 = vld [vmem:[%s1015_s11 + $0x10] ss:$8 sps:$4 sm:$0xff]  }
  0x13   : > { %816 = vmatprep.subr.bf16.mxu0 %v896_v4  ;;  %854 = vmatprep.subr.bf16.mxu1 %v896_v4  ;;  %v905_v15 = vld [vmem:[%s1063_s1 + $0x8] sm:$0xff]   ;;  %v907_v17 = vld [vmem:[%s1063_s1] sm:$0xff]   ;;  %v919_v23 = vld [vmem:[%s1015_s11 + $0x30] ss:$8 sps:$4 sm:$0xff]  }
  0x14   : > { %512 = vmatprep.mubr.bf16.mxu1 %v913_v12  ;;  %v769_v29 = vld [vmem:[%s1064_s2] ss:$0 sm:$0xff] }
  0x16   : > { %817 = vmatpush3.bf16.msra.mxu0 %v897_v5  ;;  %862 = vmatpush3.bf16.msra.mxu1 %v897_v5 }
  0x17   : > { %818 = vmatprep.subr.bf16.mxu0 %v898_v6  ;;  %855 = vmatprep.subr.bf16.mxu1 %v898_v6 }
  0x1a   : > { %819 = vmatpush3.bf16.msra.mxu0 %v899_v7  ;;  %863 = vmatpush3.bf16.msra.mxu1 %v899_v7 }
  0x1b   : > { %820 = vmatprep.subr.bf16.mxu0 %v900_v8  ;;  %856 = vmatprep.subr.bf16.mxu1 %v900_v8 }
  0x1e   : > { %821 = vmatpush3.bf16.msra.mxu0 %v901_v9  ;;  %864 = vmatpush3.bf16.msra.mxu1 %v901_v9 }
  0x1f   : > { %822 = vmatprep.subr.bf16.mxu0 %v902_v10  ;;  %857 = vmatprep.subr.bf16.mxu1 %v902_v10 }
  0x22   : > { %823 = vmatpush3.bf16.msra.mxu0 %v903_v13  ;;  %865 = vmatpush3.bf16.msra.mxu1 %v903_v13 }
  0x23   : > { %824 = vmatprep.subr.bf16.mxu0 %v904_v14  ;;  %858 = vmatprep.subr.bf16.mxu1 %v904_v14 }
  0x26   : > { %825 = vmatpush3.bf16.msra.mxu0 %v905_v15  ;;  %866 = vmatpush3.bf16.msra.mxu1 %v905_v15 }
  0x27   : > { %826 = vmatprep.subr.bf16.mxu0 %v906_v16  ;;  %859 = vmatprep.subr.bf16.mxu1 %v906_v16 }
  0x2a   : > { %827 = vmatpush3.bf16.msra.mxu0 %v907_v17  ;;  %867 = vmatpush3.bf16.msra.mxu1 %v907_v17 }
  0x2d   : > { %497 = vmatmul.mubr.bf16.vlgmr.msra.gmra.mxu0 %v908_v18  ;;  %513 = vmatmul.mubr.bf16.vlgmr.msra.gmra.mxu1 %v911_v19 }
  0x2e   : > { %504 = vmatprep.mubr.bf16.mxu0 %v914_v20  ;;  %520 = vmatprep.mubr.bf16.mxu1 %v916_v21 }
  0x35   : > { %505 = vmatmul.mubr.bf16.gmra.mxu0 %v918_v22  ;;  %521 = vmatmul.mubr.bf16.gmra.mxu1 %v919_v23 }
  0xed   : > { %v828_v24 = vpop.f32.mrf.mxu0  ;;  %v840_v25 = vpop.f32.mrf.mxu1 }
  0xef   : > { %v829_v26 = vpop.f32.mrf.mxu0  ;;  %v841_v27 = vpop.f32.mrf.mxu1 }
  0xf0   : > { %v830_v28 = vadd.f32 %v829_v26, %v828_v24  ;;  %v842_v30 = vadd.f32 %v841_v27, %v840_v25 }
  0xf1   : > { %v831_v31 = vpop.f32.mrf.mxu0  ;;  %v843_v32 = vpop.f32.mrf.mxu1 }
  0xf2   : > { %v563_v33 = vadd.f32 %v830_v28, %v769_v29  ;;  %v567_v34 = vadd.f32 %v842_v30, %v769_v29 }
  0xf3   : > { %v832_v35 = vpop.f32.mrf.mxu0  ;;  %v844_v36 = vpop.f32.mrf.mxu1 }
  0xf4   : > { %v833_v37 = vadd.f32 %v832_v35, %v831_v31  ;;  %v845_v38 = vadd.f32 %v844_v36, %v843_v32  ;;  %v571_v43 = vmax.f32 %v563_v33, 0.0  ;;  %v575_v44 = vmax.f32 %v567_v34, 0.0 }
  0xf5   : > { %v834_v39 = vpop.f32.mrf.mxu0  ;;  %v846_v40 = vpop.f32.mrf.mxu1 }
  0xf6   : > { %v564_v41 = vadd.f32 %v833_v37, %v769_v29  ;;  %v568_v42 = vadd.f32 %v845_v38, %v769_v29 }
  0xf7   : > { %v835_v45 = vpop.f32.mrf.mxu0  ;;  %v847_v46 = vpop.f32.mrf.mxu1 }
  0xf8   : > { %v572_v47 = vmax.f32 %v564_v41, 0.0  ;;  %v576_v48 = vmax.f32 %v568_v42, 0.0  ;;  %v836_v49 = vadd.f32 %v835_v45, %v834_v39  ;;  %v848_v50 = vadd.f32 %v847_v46, %v846_v40 }
  0xf9   : > { %v837_v51 = vpop.f32.mrf.mxu0  ;;  %v849_v52 = vpop.f32.mrf.mxu1 }
  0xfa   : > { %v792_v53 = vpack.c.bf16 %v572_v47, %v571_v43  ;;  %v802_v54 = vpack.c.bf16 %v576_v48, %v575_v44  ;;  %v565_v57 = vadd.f32 %v836_v49, %v769_v29  ;;  %v569_v58 = vadd.f32 %v848_v50, %v769_v29 }
  0xfb   : > { %v838_v55 = vpop.f32.mrf.mxu0  ;;  %v850_v56 = vpop.f32.mrf.mxu1 }
  0xfc   : > { %793 = vst [vmem:[%s265_s8] sm:$0xff] %v792_v53   ;;  %810 = vst [vmem:[%s265_s8 + $0x10] sm:$0xff] %v802_v54   ;;  %v839_v59 = vadd.f32 %v838_v55, %v837_v51  ;;  %v851_v60 = vadd.f32 %v850_v56, %v849_v52  ;;  %v573_v63 = vmax.f32 %v565_v57, 0.0  ;;  %v577_v0 = vmax.f32 %v569_v58, 0.0 }
  0xfe   : > { %v566_v61 = vadd.f32 %v839_v59, %v769_v29  ;;  %v570_v62 = vadd.f32 %v851_v60, %v769_v29 }
 0x100   : > { %v574_v1 = vmax.f32 %v566_v61, 0.0  ;;  %v578_v2 = vmax.f32 %v570_v62, 0.0 }
 0x102   : > { %v797_v3 = vpack.c.bf16 %v574_v1, %v573_v63  ;;  %v807_v4 = vpack.c.bf16 %v578_v2, %v577_v0 }
 0x104   : > { %809 = vst [vmem:[%s265_s8 + $0x8] sm:$0xff] %v797_v3   ;;  %811 = vst [vmem:[%s265_s8 + $0x18] sm:$0xff] %v807_v4  }
 0x105 PF: > { %s13_s14 = sadd.s32 1, %s942_s14   ;;  %s1066_s12 = smov %s938_s13 }
 0x106   : > { %p10_p5 = scmp.ge.s32.totalorder %s13_s14, 4   ;;  %s1067_s13 = smov %s1069_s15 }
 0x108   :  { %12 = sbr.rel (!%p10_p5) target bundleno = 2 (0x2), region = 76 }

// kernel: generalized_rcnn_forward.5
= control target key start
LH: loop header
LB: loop body
LE: loop exit
PB: predicated region body
PF: predicated region fallthrough
CT: control target
= control target key end

     0   :  { %s1458_s12 = smov 0   ;;  %s1460_s13 = smov 0   ;;  %s1593_s0 = inlined_call_operand.vmem [shape: bf16[512,32], index: 0, kind: input, shape index: {}]   ;;  %s1594_s1 = inlined_call_operand.vmem [shape: bf16[32,128], index: 1, kind: input, shape index: {}]   ;;  %s1595_s2 = inlined_call_operand.vmem [shape: f32[1,128], index: 2, kind: input, shape index: {}]   ;;  %s1596_s3 = inlined_call_operand.vmem [shape: bf16[512,128], index: 3, kind: output, shape index: {}]  }
   0x1   :  { %s1462_s14 = smov 0  }
   0x2 LB: > { %s32_s15 = sadd.s32 1, %s1432_s13  ;;  %p1113_p0 = scmp.ge.s32.totalorder %s1436_s14, 1  ;;  %s1436_s14 = sphi %s1462_s14, %s13_s14   ;;  %s1432_s13 = sphi %s1460_s13, %s1598_s13   ;;  %s1428_s12 = sphi %s1458_s12, %s1597_s12  }
   0x3   : > { %p34_p1 = scmp.ge.s32.totalorder %s32_s15, 2  ;;  %p188_p2 = scmp.lt.s32.totalorder %s1436_s14, 3 }
   0x5   : > { %s1600_s15 = smov (%p34_p1, %s32_s15), 0  ;;  %p189_p3 = pnand %p1113_p0, %p188_p2 }
   0x6   : > { %s1114_s18 = sshll.u32 (!%p189_p3), %s1428_s12, 5 }
   0x7   : > { %192 = sbr.rel (%p189_p3) target bundleno = 251 (0xfb), region = 32  ;;  %p230_p4 = scmp.lt.s32.totalorder (!%p189_p3), %s1114_s18, 63 }
   0xc   : > { %v1396_v0 = vld [vmem:[%s1594_s1 + $0x8] sm:$0xff]   ;;  %v1397_v1 = vld [vmem:[%s1594_s1] sm:$0xff]   ;;  %s1602_s18 = smov (!%p230_p4, %s1114_s18), 63  ;;  %vm456_vm0 = vcmask 261120  }
   0xd   : > { %1332 = vmatprep.subr.bf16.mxu0 %v1396_v0  ;;  %1368 = vmatprep.subr.bf16.mxu1 %v1396_v0  ;;  %s1115_s21 = sshll.u32 %s1602_s18, 2  ;;  %v1527_v19 = vld [vmem:[%s1595_s2] ss:$0 sm:$0xff] }
   0xe   : > { %1333 = vmatpush3.bf16.msra.mxu0 %v1396_v0  ;;  %1370 = vmatpush3.bf16.msra.mxu1 %v1396_v0  ;;  %s1490_s24 = scalar_lea.vmem %s1593_s0, %s1115_s21  ;;  %s1541_s29 = scalar_lea.vmem %s1596_s3, %s1115_s21 }
   0xf   : > { %1334 = vmatprep.subr.bf16.mxu0 %v1397_v1  ;;  %1369 = vmatprep.subr.bf16.mxu1 %v1397_v1  ;;  %v1398_v2 = vld [vmem:[%s1490_s24] sm:$0xff]   ;;  %v1400_v4 = vld [vmem:[%s1490_s24 + $0x8] sm:$0xff]   ;;  %v1402_v6 = vld [vmem:[%s1490_s24 + $0x10] sm:$0xff]  }
  0x10   : > { %v1399_v3 = vld [vmem:[%s1490_s24 + $0x40] sm:$0xff]   ;;  %1336 = vmatprep.mubr.msk.bf16.mxu0 %vm456_vm0, %v1398_v2  ;;  %v1401_v5 = vld [vmem:[%s1490_s24 + $0x48] sm:$0xff]   ;;  %v1403_v7 = vld [vmem:[%s1490_s24 + $0x50] sm:$0xff]  }
  0x11   : > { %1352 = vmatprep.mubr.msk.bf16.mxu1 %vm456_vm0, %v1399_v3  ;;  %v1404_v8 = vld [vmem:[%s1490_s24 + $0x18] sm:$0xff]   ;;  %v1406_v10 = vld [vmem:[%s1490_s24 + $0x20] sm:$0xff]   ;;  %v1408_v12 = vld [vmem:[%s1490_s24 + $0x28] sm:$0xff]  }
  0x12   : > { %1335 = vmatpush3.bf16.msra.mxu0 %v1397_v1  ;;  %1371 = vmatpush3.bf16.msra.mxu1 %v1397_v1  ;;  %v1405_v9 = vld [vmem:[%s1490_s24 + $0x58] sm:$0xff]   ;;  %v1407_v11 = vld [vmem:[%s1490_s24 + $0x60] sm:$0xff]   ;;  %v1409_v13 = vld [vmem:[%s1490_s24 + $0x68] sm:$0xff]  }
  0x13   : > { %v1410_v14 = vld [vmem:[%s1490_s24 + $0x30] sm:$0xff]   ;;  %v1412_v16 = vld [vmem:[%s1490_s24 + $0x38] sm:$0xff]  }
  0x14   : > { %v1411_v15 = vld [vmem:[%s1490_s24 + $0x70] sm:$0xff]   ;;  %v1413_v17 = vld [vmem:[%s1490_s24 + $0x78] sm:$0xff]  }
  0x15   : > { %1337 = vmatmul.mubr.msk.bf16.vlgmr.msra.gmra.mxu0 %vm456_vm0, %v1400_v4  ;;  %1353 = vmatmul.mubr.msk.bf16.vlgmr.msra.gmra.mxu1 %vm456_vm0, %v1401_v5 }
  0x16   : > { %1340 = vmatprep.mubr.msk.bf16.mxu0 %vm456_vm0, %v1402_v6  ;;  %1356 = vmatprep.mubr.msk.bf16.mxu1 %vm456_vm0, %v1403_v7 }
  0x1d   : > { %1341 = vmatmul.mubr.msk.bf16.gmra.mxu0 %vm456_vm0, %v1404_v8  ;;  %1357 = vmatmul.mubr.msk.bf16.gmra.mxu1 %vm456_vm0, %v1405_v9 }
  0x1e   : > { %1344 = vmatprep.mubr.msk.bf16.mxu0 %vm456_vm0, %v1406_v10  ;;  %1360 = vmatprep.mubr.msk.bf16.mxu1 %vm456_vm0, %v1407_v11 }
  0x25   : > { %1345 = vmatmul.mubr.msk.bf16.gmra.mxu0 %vm456_vm0, %v1408_v12  ;;  %1361 = vmatmul.mubr.msk.bf16.gmra.mxu1 %vm456_vm0, %v1409_v13 }
  0x26   : > { %1348 = vmatprep.mubr.msk.bf16.mxu0 %vm456_vm0, %v1410_v14  ;;  %1364 = vmatprep.mubr.msk.bf16.mxu1 %vm456_vm0, %v1411_v15 }
  0x2d   : > { %1349 = vmatmul.mubr.msk.bf16.gmra.mxu0 %vm456_vm0, %v1412_v16  ;;  %1365 = vmatmul.mubr.msk.bf16.gmra.mxu1 %vm456_vm0, %v1413_v17 }
  0xd5   : > { %v1338_v18 = vpop.f32.mrf.mxu0  ;;  %v1354_v20 = vpop.f32.mrf.mxu1 }
  0xd6   : > { %v774_v22 = vadd.f32 %v1338_v18, %v1527_v19  ;;  %v790_v24 = vadd.f32 %v1354_v20, %v1527_v19 }
  0xd7   : > { %v539_v21 = vpop.f32.mrf.mxu0  ;;  %v603_v23 = vpop.f32.mrf.mxu1 }
  0xd8   : > { %v772_v26 = vadd.f32 %v1527_v19, %v539_v21  ;;  %v788_v29 = vadd.f32 %v1527_v19, %v603_v23  ;;  %v806_v32 = vmax.f32 %v774_v22, 0.0  ;;  %v822_v36 = vmax.f32 %v790_v24, 0.0 }
  0xd9   : > { %v1339_v25 = vpop.f32.mrf.mxu0  ;;  %v1355_v28 = vpop.f32.mrf.mxu1 }
  0xda   : > { %v775_v27 = vadd.f32 %v1339_v25, %v1527_v19  ;;  %v791_v30 = vadd.f32 %v1355_v28, %v1527_v19  ;;  %v804_v40 = vmax.f32 %v772_v26, 0.0  ;;  %v820_v44 = vmax.f32 %v788_v29, 0.0 }
  0xdb   : > { %v542_v31 = vpop.f32.mrf.mxu0  ;;  %v606_v35 = vpop.f32.mrf.mxu1 }
  0xdc   : > { %v807_v33 = vmax.f32 %v775_v27, 0.0  ;;  %v773_v34 = vadd.f32 %v1527_v19, %v542_v31  ;;  %v823_v37 = vmax.f32 %v791_v30, 0.0  ;;  %v789_v38 = vadd.f32 %v1527_v19, %v606_v35 }
  0xdd   : > { %v1342_v39 = vpop.f32.mrf.mxu0  ;;  %v1358_v43 = vpop.f32.mrf.mxu1 }
  0xde   : > { %v1227_v41 = vpack.c.bf16 %v807_v33, %v806_v32  ;;  %v805_v42 = vmax.f32 %v773_v34, 0.0  ;;  %v1267_v45 = vpack.c.bf16 %v823_v37, %v822_v36  ;;  %v821_v46 = vmax.f32 %v789_v38, 0.0 }
  0xdf   : > { %v555_v47 = vpop.f32.mrf.mxu0  ;;  %v778_v49 = vadd.f32 %v1342_v39, %v1527_v19  ;;  %v619_v50 = vpop.f32.mrf.mxu1  ;;  %v794_v52 = vadd.f32 %v1358_v43, %v1527_v19 }
  0xe0   : > { %1299 = vst [vmem:[%s1541_s29 + $0x8] sm:$0xff] %v1227_v41   ;;  %v1222_v48 = vpack.c.bf16 %v805_v42, %v804_v40  ;;  %1307 = vst [vmem:[%s1541_s29 + $0x48] sm:$0xff] %v1267_v45   ;;  %v1262_v51 = vpack.c.bf16 %v821_v46, %v820_v44  ;;  %v776_v54 = vadd.f32 %v1527_v19, %v555_v47 }
  0xe1   : > { %v1343_v53 = vpop.f32.mrf.mxu0  ;;  %v1359_v56 = vpop.f32.mrf.mxu1  ;;  %v792_v57 = vadd.f32 %v1527_v19, %v619_v50  ;;  %v810_v60 = vmax.f32 %v778_v49, 0.0  ;;  %v826_v0 = vmax.f32 %v794_v52, 0.0 }
  0xe2   : > { %1223 = vst [vmem:[%s1541_s29] sm:$0xff] %v1222_v48   ;;  %v779_v55 = vadd.f32 %v1343_v53, %v1527_v19  ;;  %1306 = vst [vmem:[%s1541_s29 + $0x40] sm:$0xff] %v1262_v51   ;;  %v795_v58 = vadd.f32 %v1359_v56, %v1527_v19  ;;  %v808_v4 = vmax.f32 %v776_v54, 0.0 }
  0xe3   : > { %v558_v59 = vpop.f32.mrf.mxu0  ;;  %v622_v63 = vpop.f32.mrf.mxu1  ;;  %v824_v8 = vmax.f32 %v792_v57, 0.0 }
  0xe4   : > { %v811_v61 = vmax.f32 %v779_v55, 0.0  ;;  %v777_v62 = vadd.f32 %v1527_v19, %v558_v59  ;;  %v827_v1 = vmax.f32 %v795_v58, 0.0  ;;  %v793_v2 = vadd.f32 %v1527_v19, %v622_v63 }
  0xe5   : > { %v1346_v3 = vpop.f32.mrf.mxu0  ;;  %v1362_v7 = vpop.f32.mrf.mxu1 }
  0xe6   : > { %v1237_v5 = vpack.c.bf16 %v811_v61, %v810_v60  ;;  %v809_v6 = vmax.f32 %v777_v62, 0.0  ;;  %v1277_v9 = vpack.c.bf16 %v827_v1, %v826_v0  ;;  %v825_v10 = vmax.f32 %v793_v2, 0.0 }
  0xe7   : > { %v571_v11 = vpop.f32.mrf.mxu0  ;;  %v782_v13 = vadd.f32 %v1346_v3, %v1527_v19  ;;  %v635_v14 = vpop.f32.mrf.mxu1  ;;  %v798_v16 = vadd.f32 %v1362_v7, %v1527_v19 }
  0xe8   : > { %1301 = vst [vmem:[%s1541_s29 + $0x18] sm:$0xff] %v1237_v5   ;;  %v1232_v12 = vpack.c.bf16 %v809_v6, %v808_v4  ;;  %1309 = vst [vmem:[%s1541_s29 + $0x58] sm:$0xff] %v1277_v9   ;;  %v1272_v15 = vpack.c.bf16 %v825_v10, %v824_v8  ;;  %v780_v18 = vadd.f32 %v1527_v19, %v571_v11 }
  0xe9   : > { %v1347_v17 = vpop.f32.mrf.mxu0  ;;  %v1363_v21 = vpop.f32.mrf.mxu1  ;;  %v796_v22 = vadd.f32 %v1527_v19, %v635_v14  ;;  %v814_v25 = vmax.f32 %v782_v13, 0.0  ;;  %v830_v29 = vmax.f32 %v798_v16, 0.0 }
  0xea   : > { %1300 = vst [vmem:[%s1541_s29 + $0x10] sm:$0xff] %v1232_v12   ;;  %v783_v20 = vadd.f32 %v1347_v17, %v1527_v19  ;;  %1308 = vst [vmem:[%s1541_s29 + $0x50] sm:$0xff] %v1272_v15   ;;  %v799_v23 = vadd.f32 %v1363_v21, %v1527_v19  ;;  %v812_v33 = vmax.f32 %v780_v18, 0.0 }
  0xeb   : > { %v574_v24 = vpop.f32.mrf.mxu0  ;;  %v638_v28 = vpop.f32.mrf.mxu1  ;;  %v828_v37 = vmax.f32 %v796_v22, 0.0 }
  0xec   : > { %v815_v26 = vmax.f32 %v783_v20, 0.0  ;;  %v781_v27 = vadd.f32 %v1527_v19, %v574_v24  ;;  %v831_v30 = vmax.f32 %v799_v23, 0.0  ;;  %v797_v31 = vadd.f32 %v1527_v19, %v638_v28 }
  0xed   : > { %v1350_v32 = vpop.f32.mrf.mxu0  ;;  %v1366_v36 = vpop.f32.mrf.mxu1 }
  0xee   : > { %v1247_v34 = vpack.c.bf16 %v815_v26, %v814_v25  ;;  %v813_v35 = vmax.f32 %v781_v27, 0.0  ;;  %v1287_v38 = vpack.c.bf16 %v831_v30, %v830_v29  ;;  %v829_v39 = vmax.f32 %v797_v31, 0.0 }
  0xef   : > { %v587_v40 = vpop.f32.mrf.mxu0  ;;  %v786_v42 = vadd.f32 %v1350_v32, %v1527_v19  ;;  %v651_v43 = vpop.f32.mrf.mxu1  ;;  %v802_v45 = vadd.f32 %v1366_v36, %v1527_v19 }
  0xf0   : > { %1303 = vst [vmem:[%s1541_s29 + $0x28] sm:$0xff] %v1247_v34   ;;  %v1242_v41 = vpack.c.bf16 %v813_v35, %v812_v33  ;;  %1311 = vst [vmem:[%s1541_s29 + $0x68] sm:$0xff] %v1287_v38   ;;  %v1282_v44 = vpack.c.bf16 %v829_v39, %v828_v37  ;;  %v784_v47 = vadd.f32 %v1527_v19, %v587_v40 }
  0xf1   : > { %v1351_v46 = vpop.f32.mrf.mxu0  ;;  %v1367_v49 = vpop.f32.mrf.mxu1  ;;  %v800_v50 = vadd.f32 %v1527_v19, %v651_v43  ;;  %v818_v53 = vmax.f32 %v786_v42, 0.0  ;;  %v834_v57 = vmax.f32 %v802_v45, 0.0 }
  0xf2   : > { %1302 = vst [vmem:[%s1541_s29 + $0x20] sm:$0xff] %v1242_v41   ;;  %v787_v48 = vadd.f32 %v1351_v46, %v1527_v19  ;;  %1310 = vst [vmem:[%s1541_s29 + $0x60] sm:$0xff] %v1282_v44   ;;  %v803_v51 = vadd.f32 %v1367_v49, %v1527_v19  ;;  %v816_v60 = vmax.f32 %v784_v47, 0.0 }
  0xf3   : > { %v590_v52 = vpop.f32.mrf.mxu0  ;;  %v654_v56 = vpop.f32.mrf.mxu1  ;;  %v832_v63 = vmax.f32 %v800_v50, 0.0 }
  0xf4   : > { %v819_v54 = vmax.f32 %v787_v48, 0.0  ;;  %v785_v55 = vadd.f32 %v1527_v19, %v590_v52  ;;  %v835_v58 = vmax.f32 %v803_v51, 0.0  ;;  %v801_v59 = vadd.f32 %v1527_v19, %v654_v56 }
  0xf6   : > { %v1257_v61 = vpack.c.bf16 %v819_v54, %v818_v53  ;;  %v817_v62 = vmax.f32 %v785_v55, 0.0  ;;  %v1297_v0 = vpack.c.bf16 %v835_v58, %v834_v57  ;;  %v833_v1 = vmax.f32 %v801_v59, 0.0 }
  0xf8   : > { %1305 = vst [vmem:[%s1541_s29 + $0x38] sm:$0xff] %v1257_v61   ;;  %v1252_v2 = vpack.c.bf16 %v817_v62, %v816_v60  ;;  %1313 = vst [vmem:[%s1541_s29 + $0x78] sm:$0xff] %v1297_v0   ;;  %v1292_v3 = vpack.c.bf16 %v833_v1, %v832_v63 }
  0xfa   : > { %1304 = vst [vmem:[%s1541_s29 + $0x30] sm:$0xff] %v1252_v2   ;;  %1312 = vst [vmem:[%s1541_s29 + $0x70] sm:$0xff] %v1292_v3  }
  0xfb PF: > { %s13_s14 = sadd.s32 1, %s1436_s14   ;;  %s1597_s12 = smov %s1432_s13 }
  0xfc   : > { %p10_p5 = scmp.ge.s32.totalorder %s13_s14, 4   ;;  %s1598_s13 = smov %s1600_s15 }
  0xfe   :  { %12 = sbr.rel (!%p10_p5) target bundleno = 2 (0x2), region = 76 }

// kernel: generalized_rcnn_forward.8
= control target key start
LH: loop header
LB: loop body
LE: loop exit
PB: predicated region body
PF: predicated region fallthrough
CT: control target
= control target key end

     0   :  { %s683_s12 = smov 0   ;;  %s685_s13 = smov 0   ;;  %s725_s0 = inlined_call_operand.vmem [shape: bf16[128,32], index: 0, kind: input, shape index: {}]   ;;  %s726_s1 = inlined_call_operand.vmem [shape: bf16[32,128], index: 1, kind: input, shape index: {}]   ;;  %s727_s2 = inlined_call_operand.vmem [shape: f32[1,128], index: 2, kind: input, shape index: {}]   ;;  %s728_s3 = inlined_call_operand.vmem [shape: f32[128,128], index: 3, kind: output, shape index: {}]  }
   0x1   :  { %s687_s14 = smov 0  }
   0x2 LB: > { %s32_s15 = sadd.s32 1, %s657_s13  ;;  %p569_p0 = scmp.ge.s32.totalorder %s661_s14, 1  ;;  %s661_s14 = sphi %s687_s14, %s13_s14   ;;  %s657_s13 = sphi %s685_s13, %s730_s13   ;;  %s653_s12 = sphi %s683_s12, %s729_s12  }
   0x3   : > { %p34_p1 = scmp.ge.s32.totalorder %s32_s15, 2  ;;  %p188_p2 = scmp.lt.s32.totalorder %s661_s14, 3 }
   0x5   : > { %s732_s15 = smov (%p34_p1, %s32_s15), 0  ;;  %p189_p3 = pnand %p569_p0, %p188_p2 }
   0x6   : > { %s570_s18 = sshll.u32 (!%p189_p3), %s653_s12, 3 }
   0x7   : > { %192 = sbr.rel (%p189_p3) target bundleno = 223 (0xdf), region = 32  ;;  %p230_p4 = scmp.lt.s32.totalorder (!%p189_p3), %s570_s18, 15 }
   0xc   : > { %v633_v0 = vld [vmem:[%s726_s1 + $0x8] sm:$0xff]   ;;  %v634_v1 = vld [vmem:[%s726_s1] sm:$0xff]   ;;  %s734_s18 = smov (!%p230_p4, %s570_s18), 15  ;;  %vm324_vm0 = vcmask 261120  }
   0xd   : > { %593 = vmatprep.subr.bf16.mxu0 %v633_v0  ;;  %605 = vmatprep.subr.bf16.mxu1 %v633_v0  ;;  %s571_s21 = sshll.u32 %s734_s18, 2  ;;  %s573_s25 = sshll.u32 %s734_s18, 3  ;;  %v584_v6 = vld [vmem:[%s727_s2] ss:$0 sm:$0xff] }
   0xe   : > { %594 = vmatpush3.bf16.msra.mxu0 %v633_v0  ;;  %607 = vmatpush3.bf16.msra.mxu1 %v633_v0  ;;  %s236_s24 = scalar_lea.vmem %s725_s0, %s571_s21  ;;  %s257_s30 = scalar_lea.vmem %s728_s3, %s573_s25 }
   0xf   : > { %595 = vmatprep.subr.bf16.mxu0 %v634_v1  ;;  %606 = vmatprep.subr.bf16.mxu1 %v634_v1  ;;  %v635_v2 = vld [vmem:[%s236_s24] sm:$0xff]   ;;  %v636_v3 = vld [vmem:[%s236_s24 + $0x10] sm:$0xff]   ;;  %v637_v4 = vld [vmem:[%s236_s24 + $0x8] sm:$0xff]  }
  0x10   : > { %597 = vmatprep.mubr.msk.bf16.mxu0 %vm324_vm0, %v635_v2  ;;  %601 = vmatprep.mubr.msk.bf16.mxu1 %vm324_vm0, %v636_v3  ;;  %v638_v5 = vld [vmem:[%s236_s24 + $0x18] sm:$0xff]  }
  0x12   : > { %596 = vmatpush3.bf16.msra.mxu0 %v634_v1  ;;  %608 = vmatpush3.bf16.msra.mxu1 %v634_v1 }
  0x15   : > { %598 = vmatmul.mubr.msk.bf16.vlgmr.msra.gmra.mxu0 %vm324_vm0, %v637_v4  ;;  %602 = vmatmul.mubr.msk.bf16.vlgmr.msra.gmra.mxu1 %vm324_vm0, %v638_v5 }
  0xd5   : > { %v599_v7 = vpop.f32.mrf.mxu0  ;;  %v603_v9 = vpop.f32.mrf.mxu1 }
  0xd6   : > { %v438_v8 = vadd.f32 %v599_v7, %v584_v6  ;;  %v442_v10 = vadd.f32 %v603_v9, %v584_v6 }
  0xd7   : > { %v371_v11 = vpop.f32.mrf.mxu0  ;;  %v387_v13 = vpop.f32.mrf.mxu1 }
  0xd8   : > { %446 = vst [vmem:[%s257_s30 + $0x10] sm:$0xff] %v438_v8  ;;  %v436_v12 = vadd.f32 %v584_v6, %v371_v11  ;;  %450 = vst [vmem:[%s257_s30 + $0x30] sm:$0xff] %v442_v10  ;;  %v440_v14 = vadd.f32 %v584_v6, %v387_v13 }
  0xd9   : > { %v600_v15 = vpop.f32.mrf.mxu0  ;;  %v604_v17 = vpop.f32.mrf.mxu1 }
  0xda   : > { %444 = vst [vmem:[%s257_s30] sm:$0xff] %v436_v12  ;;  %v439_v16 = vadd.f32 %v600_v15, %v584_v6  ;;  %448 = vst [vmem:[%s257_s30 + $0x20] sm:$0xff] %v440_v14  ;;  %v443_v18 = vadd.f32 %v604_v17, %v584_v6 }
  0xdb   : > { %v374_v19 = vpop.f32.mrf.mxu0  ;;  %v390_v21 = vpop.f32.mrf.mxu1 }
  0xdc   : > { %447 = vst [vmem:[%s257_s30 + $0x18] sm:$0xff] %v439_v16  ;;  %v437_v20 = vadd.f32 %v584_v6, %v374_v19  ;;  %451 = vst [vmem:[%s257_s30 + $0x38] sm:$0xff] %v443_v18  ;;  %v441_v22 = vadd.f32 %v584_v6, %v390_v21 }
  0xde   : > { %445 = vst [vmem:[%s257_s30 + $0x8] sm:$0xff] %v437_v20  ;;  %449 = vst [vmem:[%s257_s30 + $0x28] sm:$0xff] %v441_v22 }
  0xdf PF: > { %s13_s14 = sadd.s32 1, %s661_s14   ;;  %s729_s12 = smov %s657_s13 }
  0xe0   : > { %p10_p5 = scmp.ge.s32.totalorder %s13_s14, 4   ;;  %s730_s13 = smov %s732_s15 }
  0xe2   :  { %12 = sbr.rel (!%p10_p5) target bundleno = 2 (0x2), region = 76 }

// kernel: generalized_rcnn_forward.7
= control target key start
LH: loop header
LB: loop body
LE: loop exit
PB: predicated region body
PF: predicated region fallthrough
CT: control target
= control target key end

     0   :  { %s1281_s12 = smov 0   ;;  %s1283_s13 = smov 0   ;;  %s1454_s0 = inlined_call_operand.vmem [shape: bf16[128,512], index: 0, kind: input, shape index: {}]   ;;  %s1455_s1 = inlined_call_operand.vmem [shape: bf16[512,128], index: 1, kind: input, shape index: {}]   ;;  %s1456_s2 = inlined_call_operand.vmem [shape: f32[1,128], index: 2, kind: input, shape index: {}]   ;;  %s1457_s3 = inlined_call_operand.vmem [shape: bf16[128,128], index: 3, kind: output, shape index: {}]  }
   0x1   :  { %s1285_s14 = smov 0  }
   0x2 LB: > { %s32_s15 = sadd.s32 1, %s1255_s13  ;;  %p980_p0 = scmp.ge.s32.totalorder %s1259_s14, 1  ;;  %s1259_s14 = sphi %s1285_s14, %s13_s14   ;;  %s1255_s13 = sphi %s1283_s13, %s1459_s13   ;;  %s1251_s12 = sphi %s1281_s12, %s1458_s12  }
   0x3   : > { %p34_p1 = scmp.ge.s32.totalorder %s32_s15, 2  ;;  %p191_p2 = scmp.lt.s32.totalorder %s1259_s14, 3 }
   0x5   : > { %s1461_s15 = smov (%p34_p1, %s32_s15), 0  ;;  %p192_p3 = pnand %p980_p0, %p191_p2 }
   0x6   : > { %s981_s25 = sshll.u32 (!%p192_p3), %s1251_s12, 3 }
   0x7   : > { %195 = sbr.rel (%p192_p3) target bundleno = 281 (0x119), region = 32  ;;  %p236_p4 = scmp.lt.s32.totalorder (!%p192_p3), %s981_s25, 15 }
   0xc   : > { %v1181_v0 = vld [vmem:[%s1455_s1 + $0x78] sm:$0xff]   ;;  %v1185_v4 = vld [vmem:[%s1455_s1 + $0x70] sm:$0xff]   ;;  %v1189_v8 = vld [vmem:[%s1455_s1 + $0x68] sm:$0xff]   ;;  %s1463_s25 = smov (!%p236_p4, %s981_s25), 15 }
   0xd   : > { %v1182_v1 = vld [vmem:[%s1455_s1 + $0xf8] sm:$0xff]   ;;  %1077 = vmatprep.subr.bf16.mxu0 %v1181_v0  ;;  %v1186_v5 = vld [vmem:[%s1455_s1 + $0xf0] sm:$0xff]   ;;  %v1190_v9 = vld [vmem:[%s1455_s1 + $0xe8] sm:$0xff]   ;;  %s1045_s24 = sshll.u32 %s1463_s25, 4  ;;  %s985_s17 = sshll.u32 %s1463_s25, 2 }
   0xe   : > { %v1183_v2 = vld [vmem:[%s1455_s1 + $0x38] sm:$0xff]   ;;  %1117 = vmatprep.subr.bf16.mxu1 %v1182_v1  ;;  %v1187_v6 = vld [vmem:[%s1455_s1 + $0x30] sm:$0xff]   ;;  %v1191_v10 = vld [vmem:[%s1455_s1 + $0x28] sm:$0xff]   ;;  %s1398_s12 = scalar_lea.vmem %s1454_s0, %s1045_s24  ;;  %s1433_s20 = scalar_lea.vmem %s1457_s3, %s985_s17 }
   0xf   : > { %v1184_v3 = vld [vmem:[%s1455_s1 + $0xb8] sm:$0xff]   ;;  %1078 = vmatpush3.bf16.msra.mxu0 %v1183_v2  ;;  %v1188_v7 = vld [vmem:[%s1455_s1 + $0xb0] sm:$0xff]   ;;  %v1192_v11 = vld [vmem:[%s1455_s1 + $0xa8] sm:$0xff]  }
  0x10   : > { %1118 = vmatpush3.bf16.msra.mxu1 %v1184_v3  ;;  %1079 = vmatprep.subr.bf16.mxu0 %v1185_v4  ;;  %v1193_v12 = vld [vmem:[%s1455_s1 + $0x60] sm:$0xff]   ;;  %v1197_v16 = vld [vmem:[%s1455_s1 + $0x58] sm:$0xff]   ;;  %v1201_v20 = vld [vmem:[%s1455_s1 + $0x50] sm:$0xff]  }
  0x11   : > { %1119 = vmatprep.subr.bf16.mxu1 %v1186_v5  ;;  %v1194_v13 = vld [vmem:[%s1455_s1 + $0xe0] sm:$0xff]   ;;  %v1198_v17 = vld [vmem:[%s1455_s1 + $0xd8] sm:$0xff]   ;;  %v1202_v21 = vld [vmem:[%s1455_s1 + $0xd0] sm:$0xff]  }
  0x12   : > { %v1195_v14 = vld [vmem:[%s1455_s1 + $0x20] sm:$0xff]   ;;  %v1199_v18 = vld [vmem:[%s1455_s1 + $0x18] sm:$0xff]   ;;  %v1203_v22 = vld [vmem:[%s1455_s1 + $0x10] sm:$0xff]  }
  0x13   : > { %1080 = vmatpush3.bf16.msra.mxu0 %v1187_v6  ;;  %v1196_v15 = vld [vmem:[%s1455_s1 + $0xa0] sm:$0xff]   ;;  %v1200_v19 = vld [vmem:[%s1455_s1 + $0x98] sm:$0xff]   ;;  %v1204_v23 = vld [vmem:[%s1455_s1 + $0x90] sm:$0xff]  }
  0x14   : > { %1120 = vmatpush3.bf16.msra.mxu1 %v1188_v7  ;;  %1081 = vmatprep.subr.bf16.mxu0 %v1189_v8  ;;  %v1205_v24 = vld [vmem:[%s1455_s1 + $0x48] sm:$0xff]   ;;  %v1209_v28 = vld [vmem:[%s1455_s1 + $0x40] sm:$0xff]  }
  0x15   : > { %1121 = vmatprep.subr.bf16.mxu1 %v1190_v9  ;;  %v1206_v25 = vld [vmem:[%s1455_s1 + $0xc8] sm:$0xff]   ;;  %v1210_v29 = vld [vmem:[%s1455_s1 + $0xc0] sm:$0xff]  }
  0x16   : > { %v1207_v26 = vld [vmem:[%s1455_s1 + $0x8] sm:$0xff]   ;;  %v1211_v30 = vld [vmem:[%s1455_s1] sm:$0xff]  }
  0x17   : > { %1082 = vmatpush3.bf16.msra.mxu0 %v1191_v10  ;;  %v1208_v27 = vld [vmem:[%s1455_s1 + $0x88] sm:$0xff]   ;;  %v1212_v31 = vld [vmem:[%s1455_s1 + $0x80] sm:$0xff]  }
  0x18   : > { %1122 = vmatpush3.bf16.msra.mxu1 %v1192_v11  ;;  %1083 = vmatprep.subr.bf16.mxu0 %v1193_v12  ;;  %v1213_v32 = vld [vmem:[%s1398_s12] ss:$16 sps:$4 sm:$0xff]   ;;  %v1215_v33 = vld [vmem:[%s1398_s12 + $0x4] ss:$16 sps:$4 sm:$0xff]   ;;  %v1216_v34 = vld [vmem:[%s1398_s12 + $0x8] ss:$16 sps:$4 sm:$0xff]  }
  0x19   : > { %1123 = vmatprep.subr.bf16.mxu1 %v1194_v13  ;;  %v1218_v35 = vld [vmem:[%s1398_s12 + $0xc] ss:$16 sps:$4 sm:$0xff]   ;;  %672 = vmatprep.mubr.bf16.mxu0 %v1215_v33  ;;  %v1219_v36 = vld [vmem:[%s1398_s12 + $0x24] ss:$16 sps:$4 sm:$0xff]   ;;  %v1223_v38 = vld [vmem:[%s1398_s12 + $0x20] ss:$16 sps:$4 sm:$0xff]  }
  0x1a   : > { %737 = vmatprep.mubr.bf16.mxu1 %v1218_v35  ;;  %v1221_v37 = vld [vmem:[%s1398_s12 + $0x2c] ss:$16 sps:$4 sm:$0xff]   ;;  %v1224_v39 = vld [vmem:[%s1398_s12 + $0x28] ss:$16 sps:$4 sm:$0xff]   ;;  %v1225_v40 = vld [vmem:[%s1398_s12 + $0x44] ss:$16 sps:$4 sm:$0xff]  }
  0x1b   : > { %1084 = vmatpush3.bf16.msra.mxu0 %v1195_v14  ;;  %v1227_v41 = vld [vmem:[%s1398_s12 + $0x4c] ss:$16 sps:$4 sm:$0xff]   ;;  %v1229_v42 = vld [vmem:[%s1398_s12 + $0x40] ss:$16 sps:$4 sm:$0xff]   ;;  %v1230_v43 = vld [vmem:[%s1398_s12 + $0x48] ss:$16 sps:$4 sm:$0xff]  }
  0x1c   : > { %1124 = vmatpush3.bf16.msra.mxu1 %v1196_v15  ;;  %1085 = vmatprep.subr.bf16.mxu0 %v1197_v16  ;;  %v1231_v44 = vld [vmem:[%s1398_s12 + $0x64] ss:$16 sps:$4 sm:$0xff]   ;;  %v1233_v45 = vld [vmem:[%s1398_s12 + $0x6c] ss:$16 sps:$4 sm:$0xff]   ;;  %v1235_v46 = vld [vmem:[%s1398_s12 + $0x60] ss:$16 sps:$4 sm:$0xff]  }
  0x1d   : > { %1125 = vmatprep.subr.bf16.mxu1 %v1198_v17  ;;  %v1236_v47 = vld [vmem:[%s1398_s12 + $0x68] ss:$16 sps:$4 sm:$0xff]   ;;  %v1425_v58 = vld [vmem:[%s1456_s2] ss:$0 sm:$0xff] }
  0x1f   : > { %1086 = vmatpush3.bf16.msra.mxu0 %v1199_v18 }
  0x20   : > { %1126 = vmatpush3.bf16.msra.mxu1 %v1200_v19  ;;  %1087 = vmatprep.subr.bf16.mxu0 %v1201_v20 }
  0x21   : > { %1127 = vmatprep.subr.bf16.mxu1 %v1202_v21 }
  0x23   : > { %1088 = vmatpush3.bf16.msra.mxu0 %v1203_v22 }
  0x24   : > { %1128 = vmatpush3.bf16.msra.mxu1 %v1204_v23  ;;  %1089 = vmatprep.subr.bf16.mxu0 %v1205_v24 }
  0x25   : > { %1129 = vmatprep.subr.bf16.mxu1 %v1206_v25 }
  0x27   : > { %1090 = vmatpush3.bf16.msra.mxu0 %v1207_v26 }
  0x28   : > { %1130 = vmatpush3.bf16.msra.mxu1 %v1208_v27  ;;  %1091 = vmatprep.subr.bf16.mxu0 %v1209_v28 }
  0x29   : > { %1131 = vmatprep.subr.bf16.mxu1 %v1210_v29 }
  0x2b   : > { %1092 = vmatpush3.bf16.msra.mxu0 %v1211_v30 }
  0x2c   : > { %1132 = vmatpush3.bf16.msra.mxu1 %v1212_v31 }
  0x2e   : > { %673 = vmatmul.mubr.bf16.vlgmr.msra.gmra.mxu0 %v1213_v32 }
  0x2f   : > { %738 = vmatmul.mubr.bf16.vlgmr.msra.gmra.mxu1 %v1216_v34  ;;  %680 = vmatprep.mubr.bf16.mxu0 %v1219_v36 }
  0x30   : > { %745 = vmatprep.mubr.bf16.mxu1 %v1221_v37 }
  0x36   : > { %681 = vmatmul.mubr.bf16.gmra.mxu0 %v1223_v38 }
  0x37   : > { %746 = vmatmul.mubr.bf16.gmra.mxu1 %v1224_v39  ;;  %688 = vmatprep.mubr.bf16.mxu0 %v1225_v40 }
  0x38   : > { %753 = vmatprep.mubr.bf16.mxu1 %v1227_v41 }
  0x3e   : > { %689 = vmatmul.mubr.bf16.gmra.mxu0 %v1229_v42 }
  0x3f   : > { %754 = vmatmul.mubr.bf16.gmra.mxu1 %v1230_v43  ;;  %696 = vmatprep.mubr.bf16.mxu0 %v1231_v44 }
  0x40   : > { %761 = vmatprep.mubr.bf16.mxu1 %v1233_v45 }
  0x46   : > { %697 = vmatmul.mubr.bf16.gmra.mxu0 %v1235_v46 }
  0x47   : > { %762 = vmatmul.mubr.bf16.gmra.mxu1 %v1236_v47 }
  0xee   : > { %v1093_v48 = vpop.f32.mrf.mxu0 }
  0xef   : > { %v1133_v49 = vpop.f32.mrf.mxu1 }
  0xf0   : > { %v1094_v50 = vpop.f32.mrf.mxu0 }
  0xf1   : > { %v1095_v51 = vadd.f32 %v1094_v50, %v1093_v48  ;;  %v1134_v52 = vpop.f32.mrf.mxu1 }
  0xf2   : > { %v1135_v53 = vadd.f32 %v1134_v52, %v1133_v49  ;;  %v1096_v54 = vpop.f32.mrf.mxu0 }
  0xf3   : > { %v1136_v55 = vpop.f32.mrf.mxu1 }
  0xf4   : > { %v740_v56 = vadd.f32 %v1135_v53, %v1095_v51  ;;  %v1097_v57 = vpop.f32.mrf.mxu0 }
  0xf5   : > { %v1098_v59 = vadd.f32 %v1097_v57, %v1096_v54  ;;  %v1137_v60 = vpop.f32.mrf.mxu1 }
  0xf6   : > { %v1138_v61 = vadd.f32 %v1137_v60, %v1136_v55  ;;  %v1099_v62 = vpop.f32.mrf.mxu0  ;;  %v804_v0 = vadd.f32 %v1425_v58, %v740_v56 }
  0xf7   : > { %v1139_v63 = vpop.f32.mrf.mxu1 }
  0xf8   : > { %v743_v1 = vadd.f32 %v1138_v61, %v1098_v59  ;;  %v1100_v2 = vpop.f32.mrf.mxu0  ;;  %v812_v9 = vmax.f32 %v804_v0, 0.0 }
  0xf9   : > { %v1101_v3 = vadd.f32 %v1100_v2, %v1099_v62  ;;  %v1140_v4 = vpop.f32.mrf.mxu1 }
  0xfa   : > { %v805_v5 = vadd.f32 %v1425_v58, %v743_v1  ;;  %v1141_v6 = vadd.f32 %v1140_v4, %v1139_v63  ;;  %v1102_v7 = vpop.f32.mrf.mxu0 }
  0xfb   : > { %v1142_v8 = vpop.f32.mrf.mxu1 }
  0xfc   : > { %v813_v10 = vmax.f32 %v805_v5, 0.0  ;;  %v748_v11 = vadd.f32 %v1141_v6, %v1101_v3  ;;  %v1103_v12 = vpop.f32.mrf.mxu0 }
  0xfd   : > { %v1104_v13 = vadd.f32 %v1103_v12, %v1102_v7  ;;  %v1143_v14 = vpop.f32.mrf.mxu1 }
  0xfe   : > { %v1057_v15 = vpack.c.bf16 %v813_v10, %v812_v9  ;;  %v1144_v16 = vadd.f32 %v1143_v14, %v1142_v8  ;;  %v1105_v17 = vpop.f32.mrf.mxu0  ;;  %v806_v19 = vadd.f32 %v1425_v58, %v748_v11 }
  0xff   : > { %v1145_v18 = vpop.f32.mrf.mxu1 }
 0x100   : > { %1058 = vst [vmem:[%s1433_s20] sm:$0xff] %v1057_v15   ;;  %v751_v20 = vadd.f32 %v1144_v16, %v1104_v13  ;;  %v1106_v21 = vpop.f32.mrf.mxu0  ;;  %v814_v28 = vmax.f32 %v806_v19, 0.0 }
 0x101   : > { %v1107_v22 = vadd.f32 %v1106_v21, %v1105_v17  ;;  %v1146_v23 = vpop.f32.mrf.mxu1 }
 0x102   : > { %v807_v24 = vadd.f32 %v1425_v58, %v751_v20  ;;  %v1147_v25 = vadd.f32 %v1146_v23, %v1145_v18  ;;  %v1108_v26 = vpop.f32.mrf.mxu0 }
 0x103   : > { %v1148_v27 = vpop.f32.mrf.mxu1 }
 0x104   : > { %v815_v29 = vmax.f32 %v807_v24, 0.0  ;;  %v756_v30 = vadd.f32 %v1147_v25, %v1107_v22  ;;  %v1109_v31 = vpop.f32.mrf.mxu0 }
 0x105   : > { %v1110_v32 = vadd.f32 %v1109_v31, %v1108_v26  ;;  %v1149_v33 = vpop.f32.mrf.mxu1 }
 0x106   : > { %v1062_v34 = vpack.c.bf16 %v815_v29, %v814_v28  ;;  %v1150_v35 = vadd.f32 %v1149_v33, %v1148_v27  ;;  %v1111_v36 = vpop.f32.mrf.mxu0  ;;  %v808_v38 = vadd.f32 %v1425_v58, %v756_v30 }
 0x107   : > { %v1151_v37 = vpop.f32.mrf.mxu1 }
 0x108   : > { %1074 = vst [vmem:[%s1433_s20 + $0x8] sm:$0xff] %v1062_v34   ;;  %v759_v39 = vadd.f32 %v1150_v35, %v1110_v32  ;;  %v1112_v40 = vpop.f32.mrf.mxu0  ;;  %v816_v47 = vmax.f32 %v808_v38, 0.0 }
 0x109   : > { %v1113_v41 = vadd.f32 %v1112_v40, %v1111_v36  ;;  %v1152_v42 = vpop.f32.mrf.mxu1 }
 0x10a   : > { %v809_v43 = vadd.f32 %v1425_v58, %v759_v39  ;;  %v1153_v44 = vadd.f32 %v1152_v42, %v1151_v37  ;;  %v1114_v45 = vpop.f32.mrf.mxu0 }
 0x10b   : > { %v1154_v46 = vpop.f32.mrf.mxu1 }
 0x10c   : > { %v817_v48 = vmax.f32 %v809_v43, 0.0  ;;  %v764_v49 = vadd.f32 %v1153_v44, %v1113_v41  ;;  %v1115_v50 = vpop.f32.mrf.mxu0 }
 0x10d   : > { %v1116_v51 = vadd.f32 %v1115_v50, %v1114_v45  ;;  %v1155_v52 = vpop.f32.mrf.mxu1 }
 0x10e   : > { %v1067_v53 = vpack.c.bf16 %v817_v48, %v816_v47  ;;  %v1156_v54 = vadd.f32 %v1155_v52, %v1154_v46  ;;  %v810_v55 = vadd.f32 %v1425_v58, %v764_v49 }
 0x110   : > { %1075 = vst [vmem:[%s1433_s20 + $0x10] sm:$0xff] %v1067_v53   ;;  %v767_v56 = vadd.f32 %v1156_v54, %v1116_v51  ;;  %v818_v59 = vmax.f32 %v810_v55, 0.0 }
 0x112   : > { %v811_v57 = vadd.f32 %v1425_v58, %v767_v56 }
 0x114   : > { %v819_v60 = vmax.f32 %v811_v57, 0.0 }
 0x116   : > { %v1072_v61 = vpack.c.bf16 %v819_v60, %v818_v59 }
 0x118   : > { %1076 = vst [vmem:[%s1433_s20 + $0x18] sm:$0xff] %v1072_v61  }
 0x119 PF: > { %s13_s14 = sadd.s32 1, %s1259_s14   ;;  %s1458_s12 = smov %s1255_s13 }
 0x11a   : > { %p10_p5 = scmp.ge.s32.totalorder %s13_s14, 4   ;;  %s1459_s13 = smov %s1461_s15 }
 0x11c   :  { %12 = sbr.rel (!%p10_p5) target bundleno = 2 (0x2), region = 76 }

// kernel: generalized_rcnn_forward.9
= control target key start
LH: loop header
LB: loop body
LE: loop exit
PB: predicated region body
PF: predicated region fallthrough
CT: control target
= control target key end

     0   :  { %s1227_s24 = smov 0   ;;  %s1421_s0 = inlined_call_operand.vmem [shape: bf16[32,512], index: 0, kind: input, shape index: {}]   ;;  %s1422_s1 = inlined_call_operand.vmem [shape: bf16[512,128], index: 1, kind: input, shape index: {}]   ;;  %s1423_s2 = inlined_call_operand.vmem [shape: f32[1,128], index: 2, kind: input, shape index: {}]   ;;  %s1424_s3 = inlined_call_operand.vmem [shape: bf16[128,128], index: 3, kind: input, shape index: {}]   ;;  %s1425_s4 = inlined_call_operand.vmem [shape: f32[1,128], index: 4, kind: input, shape index: {}]   ;;  %s1426_s5 = inlined_call_operand.vmem [shape: bf16[128,128], index: 5, kind: input, shape index: {}]   ;;  %s1427_s6 = inlined_call_operand.vmem [shape: f32[1,128], index: 6, kind: input, shape index: {}]   ;;  %s1428_s7 = inlined_call_operand.vmem [shape: f32[32,128], index: 7, kind: output, shape index: {}]  }
   0x1 LB: > { %s943_s25 = sadd.s32 4294967295, %s1183_s24   ;;  %p947_p0 = scmp.ge.s32.totalorder %s1183_s24, 1  ;;  %s1183_s24 = sphi %s1227_s24, %s17_s24  }
   0x2   : > { %p239_p1 = scmp.lt.s32.totalorder %s1183_s24, 3 }
   0x4   : > { %p240_p2 = pnand %p947_p0, %p239_p1 }
   0x5   : > { %s948_s14 = sshll.u32 (!%p240_p2), %s943_s25, 1 }
   0x6   : > { %243 = sbr.rel (%p240_p2) target bundleno = 657 (0x291), region = 48  ;;  %p273_p3 = scmp.lt.s32.totalorder (!%p240_p2), %s948_s14, 3 }
   0xb   : > { %v1123_v0 = vld [vmem:[%s1422_s1 + $0x78] sm:$0xff]   ;;  %v1127_v4 = vld [vmem:[%s1422_s1 + $0x70] sm:$0xff]   ;;  %v1131_v8 = vld [vmem:[%s1422_s1 + $0x68] sm:$0xff]   ;;  %s1430_s14 = smov (!%p273_p3, %s948_s14), 3  ;;  %v1185_v34 = vmov 0.0   ;;  %vm1186_vm0 = vmmov 0  }
   0xc   : > { %v1124_v1 = vld [vmem:[%s1422_s1 + $0xf8] sm:$0xff]   ;;  %1011 = vmatprep.subr.bf16.mxu0 %v1123_v0  ;;  %v1128_v5 = vld [vmem:[%s1422_s1 + $0xf0] sm:$0xff]   ;;  %v1132_v9 = vld [vmem:[%s1422_s1 + $0xe8] sm:$0xff]   ;;  %s1010_s16 = sshll.u32 %s1430_s14, 4  ;;  %s952_s23 = sshll.u32 %s1430_s14, 3 }
   0xd   : > { %v1125_v2 = vld [vmem:[%s1422_s1 + $0x38] sm:$0xff]   ;;  %1033 = vmatprep.subr.bf16.mxu1 %v1124_v1  ;;  %v1129_v6 = vld [vmem:[%s1422_s1 + $0x30] sm:$0xff]   ;;  %v1133_v10 = vld [vmem:[%s1422_s1 + $0x28] sm:$0xff]   ;;  %s277_s26 = scalar_lea.vmem %s1421_s0, %s1010_s16  ;;  %s283_s30 = scalar_lea.vmem %s1428_s7, %s952_s23 }
   0xe   : > { %v1126_v3 = vld [vmem:[%s1422_s1 + $0xb8] sm:$0xff]   ;;  %1012 = vmatpush3.bf16.msra.mxu0 %v1125_v2  ;;  %v1130_v7 = vld [vmem:[%s1422_s1 + $0xb0] sm:$0xff]   ;;  %v1134_v11 = vld [vmem:[%s1422_s1 + $0xa8] sm:$0xff]  }
   0xf   : > { %1034 = vmatpush3.bf16.msra.mxu1 %v1126_v3  ;;  %1013 = vmatprep.subr.bf16.mxu0 %v1127_v4  ;;  %v1135_v12 = vld [vmem:[%s1422_s1 + $0x60] sm:$0xff]   ;;  %v1139_v16 = vld [vmem:[%s1422_s1 + $0x58] sm:$0xff]   ;;  %v1143_v20 = vld [vmem:[%s1422_s1 + $0x50] sm:$0xff]  }
  0x10   : > { %1035 = vmatprep.subr.bf16.mxu1 %v1128_v5  ;;  %v1136_v13 = vld [vmem:[%s1422_s1 + $0xe0] sm:$0xff]   ;;  %v1140_v17 = vld [vmem:[%s1422_s1 + $0xd8] sm:$0xff]   ;;  %v1144_v21 = vld [vmem:[%s1422_s1 + $0xd0] sm:$0xff]  }
  0x11   : > { %v1137_v14 = vld [vmem:[%s1422_s1 + $0x20] sm:$0xff]   ;;  %v1141_v18 = vld [vmem:[%s1422_s1 + $0x18] sm:$0xff]   ;;  %v1145_v22 = vld [vmem:[%s1422_s1 + $0x10] sm:$0xff]  }
  0x12   : > { %1014 = vmatpush3.bf16.msra.mxu0 %v1129_v6  ;;  %v1138_v15 = vld [vmem:[%s1422_s1 + $0xa0] sm:$0xff]   ;;  %v1142_v19 = vld [vmem:[%s1422_s1 + $0x98] sm:$0xff]   ;;  %v1146_v23 = vld [vmem:[%s1422_s1 + $0x90] sm:$0xff]  }
  0x13   : > { %1036 = vmatpush3.bf16.msra.mxu1 %v1130_v7  ;;  %1015 = vmatprep.subr.bf16.mxu0 %v1131_v8  ;;  %v1147_v24 = vld [vmem:[%s1422_s1 + $0x48] sm:$0xff]   ;;  %v1151_v28 = vld [vmem:[%s1422_s1 + $0x40] sm:$0xff]   ;;  %v1161_v37 = vld [vmem:[%s1424_s3 + $0x38] sm:$0xff]  }
  0x14   : > { %1037 = vmatprep.subr.bf16.mxu1 %v1132_v9  ;;  %v1148_v25 = vld [vmem:[%s1422_s1 + $0xc8] sm:$0xff]   ;;  %v1152_v29 = vld [vmem:[%s1422_s1 + $0xc0] sm:$0xff]   ;;  %v1162_v38 = vld [vmem:[%s1424_s3 + $0x30] sm:$0xff]  }
  0x15   : > { %v1149_v26 = vld [vmem:[%s1422_s1 + $0x8] sm:$0xff]   ;;  %v1153_v30 = vld [vmem:[%s1422_s1] sm:$0xff]   ;;  %v1165_v41 = vld [vmem:[%s1424_s3 + $0x18] sm:$0xff]  }
  0x16   : > { %1016 = vmatpush3.bf16.msra.mxu0 %v1133_v10  ;;  %v1150_v27 = vld [vmem:[%s1422_s1 + $0x88] sm:$0xff]   ;;  %v1154_v31 = vld [vmem:[%s1422_s1 + $0x80] sm:$0xff]   ;;  %v1166_v42 = vld [vmem:[%s1424_s3 + $0x10] sm:$0xff]  }
  0x17   : > { %1038 = vmatpush3.bf16.msra.mxu1 %v1134_v11  ;;  %1017 = vmatprep.subr.bf16.mxu0 %v1135_v12  ;;  %v1155_v32 = vld [vmem:[%s277_s26] ss:$16 sps:$4 sm:$0xff]   ;;  %v1157_v33 = vld [vmem:[%s277_s26 + $0x4] ss:$16 sps:$4 sm:$0xff]   ;;  %v1158_v35 = vld [vmem:[%s277_s26 + $0x8] ss:$16 sps:$4 sm:$0xff]  }
  0x18   : > { %1039 = vmatprep.subr.bf16.mxu1 %v1136_v13  ;;  %v1160_v36 = vld [vmem:[%s277_s26 + $0xc] ss:$16 sps:$4 sm:$0xff]   ;;  %605 = vmatprep.mubr.bf16.mxu0 %v1157_v33  ;;  %v1164_v40 = vld [vmem:[%s1424_s3 + $0x20] sm:$0xff]   ;;  %v1170_v46 = vld [vmem:[%s1426_s5 + $0x30] sm:$0xff]  }
  0x19   : > { %646 = vmatprep.mubr.bf16.mxu1 %v1160_v36  ;;  %v1163_v39 = vld [vmem:[%s1424_s3 + $0x28] sm:$0xff]   ;;  %v1168_v44 = vld [vmem:[%s1424_s3] sm:$0xff]   ;;  %v1169_v45 = vld [vmem:[%s1426_s5 + $0x38] sm:$0xff]  }
  0x1a   : > { %1018 = vmatpush3.bf16.msra.mxu0 %v1137_v14  ;;  %v1167_v43 = vld [vmem:[%s1424_s3 + $0x8] sm:$0xff]   ;;  %v1172_v48 = vld [vmem:[%s1426_s5 + $0x20] sm:$0xff]   ;;  %v1173_v49 = vld [vmem:[%s1426_s5 + $0x18] sm:$0xff]  }
  0x1b   : > { %1040 = vmatpush3.bf16.msra.mxu1 %v1138_v15  ;;  %1019 = vmatprep.subr.bf16.mxu0 %v1139_v16  ;;  %v1171_v47 = vld [vmem:[%s1426_s5 + $0x28] sm:$0xff]   ;;  %v953_v52 = vld [vmem:[%s1423_s2] ss:$0 sm:$0xff]  ;;  %v1174_v6 = vld [vmem:[%s1426_s5 + $0x10] sm:$0xff]  }
  0x1c   : > { %1041 = vmatprep.subr.bf16.mxu1 %v1140_v17  ;;  %v1175_v7 = vld [vmem:[%s1426_s5 + $0x8] sm:$0xff]   ;;  %v1176_v8 = vld [vmem:[%s1426_s5] sm:$0xff]  }
  0x1d   : > { %v990_v9 = vld [vmem:[%s1425_s4] ss:$0 sm:$0xff] }
  0x1e   : > { %1020 = vmatpush3.bf16.msra.mxu0 %v1141_v18 }
  0x1f   : > { %1042 = vmatpush3.bf16.msra.mxu1 %v1142_v19  ;;  %1021 = vmatprep.subr.bf16.mxu0 %v1143_v20  ;;  %v999_v19 = vld [vmem:[%s1427_s6] ss:$0 sm:$0xff] }
  0x20   : > { %1043 = vmatprep.subr.bf16.mxu1 %v1144_v21 }
  0x22   : > { %1022 = vmatpush3.bf16.msra.mxu0 %v1145_v22 }
  0x23   : > { %1044 = vmatpush3.bf16.msra.mxu1 %v1146_v23  ;;  %1023 = vmatprep.subr.bf16.mxu0 %v1147_v24 }
  0x24   : > { %1045 = vmatprep.subr.bf16.mxu1 %v1148_v25 }
  0x26   : > { %1024 = vmatpush3.bf16.msra.mxu0 %v1149_v26 }
  0x27   : > { %1046 = vmatpush3.bf16.msra.mxu1 %v1150_v27  ;;  %1025 = vmatprep.subr.bf16.mxu0 %v1151_v28 }
  0x28   : > { %1047 = vmatprep.subr.bf16.mxu1 %v1152_v29 }
  0x2a   : > { %1026 = vmatpush3.bf16.msra.mxu0 %v1153_v30 }
  0x2b   : > { %1048 = vmatpush3.bf16.msra.mxu1 %v1154_v31  ;;  %1073 = vmatprep.subr.bf16.mxu0 %v1185_v34 }
  0x2c   : > { %1093 = vmatprep.subr.bf16.mxu1 %v1185_v34 }
  0x2d   : > { %606 = vmatmul.mubr.bf16.vlgmr.msra.gmra.mxu0 %v1155_v32 }
  0x2e   : > { %647 = vmatmul.mubr.bf16.vlgmr.msra.gmra.mxu1 %v1158_v35  ;;  %1074 = vmatpush3.bf16.msra.mxu0 %v1161_v37 }
  0x2f   : > { %1075 = vmatprep.subr.bf16.mxu0 %v1185_v34  ;;  %1089 = vmatprep.mubr.msk.bf16.mxu0 %vm1186_vm0, %v1185_v34 }
  0x30   : > { %1109 = vmatprep.mubr.msk.bf16.mxu1 %vm1186_vm0, %v1185_v34  ;;  %1094 = vmatpush3.bf16.msra.mxu1 %v1169_v45 }
  0x31   : > { %1095 = vmatprep.subr.bf16.mxu1 %v1185_v34 }
  0x32   : > { %1076 = vmatpush3.bf16.msra.mxu0 %v1162_v38 }
  0x33   : > { %1077 = vmatprep.subr.bf16.mxu0 %v1185_v34 }
  0x34   : > { %1096 = vmatpush3.bf16.msra.mxu1 %v1170_v46 }
  0x35   : > { %1097 = vmatprep.subr.bf16.mxu1 %v1185_v34 }
  0x36   : > { %1078 = vmatpush3.bf16.msra.mxu0 %v1163_v39 }
  0x37   : > { %1079 = vmatprep.subr.bf16.mxu0 %v1185_v34 }
  0x38   : > { %1098 = vmatpush3.bf16.msra.mxu1 %v1171_v47 }
  0x39   : > { %1099 = vmatprep.subr.bf16.mxu1 %v1185_v34 }
  0x3a   : > { %1080 = vmatpush3.bf16.msra.mxu0 %v1164_v40 }
  0x3b   : > { %1081 = vmatprep.subr.bf16.mxu0 %v1185_v34 }
  0x3c   : > { %1100 = vmatpush3.bf16.msra.mxu1 %v1172_v48 }
  0x3d   : > { %1101 = vmatprep.subr.bf16.mxu1 %v1185_v34 }
  0x3e   : > { %1082 = vmatpush3.bf16.msra.mxu0 %v1165_v41 }
  0x3f   : > { %1083 = vmatprep.subr.bf16.mxu0 %v1185_v34 }
  0x40   : > { %1102 = vmatpush3.bf16.msra.mxu1 %v1173_v49 }
  0x41   : > { %1103 = vmatprep.subr.bf16.mxu1 %v1185_v34 }
  0x42   : > { %1084 = vmatpush3.bf16.msra.mxu0 %v1166_v42 }
  0x43   : > { %1085 = vmatprep.subr.bf16.mxu0 %v1185_v34 }
  0x44   : > { %1104 = vmatpush3.bf16.msra.mxu1 %v1174_v6 }
  0x45   : > { %1105 = vmatprep.subr.bf16.mxu1 %v1185_v34 }
  0x46   : > { %1086 = vmatpush3.bf16.msra.mxu0 %v1167_v43 }
  0x47   : > { %1087 = vmatprep.subr.bf16.mxu0 %v1185_v34 }
  0x48   : > { %1106 = vmatpush3.bf16.msra.mxu1 %v1175_v7 }
  0x49   : > { %1107 = vmatprep.subr.bf16.mxu1 %v1185_v34 }
  0x4a   : > { %1088 = vmatpush3.bf16.msra.mxu0 %v1168_v44 }
  0x4c   : > { %1108 = vmatpush3.bf16.msra.mxu1 %v1176_v8 }
  0xed   : > { %v1027_v50 = vpop.f32.mrf.mxu0 }
  0xee   : > { %v1049_v51 = vpop.f32.mrf.mxu1 }
  0xef   : > { %v1028_v53 = vpop.f32.mrf.mxu0 }
  0xf0   : > { %v1029_v54 = vadd.f32 %v1028_v53, %v1027_v50  ;;  %v1050_v55 = vpop.f32.mrf.mxu1 }
  0xf1   : > { %v1030_v56 = vpop.f32.mrf.mxu0  ;;  %v1051_v60 = vadd.f32 %v1050_v55, %v1049_v51 }
  0xf2   : > { %v608_v57 = vadd.f32 %v1029_v54, %v953_v52  ;;  %v1052_v58 = vpop.f32.mrf.mxu1 }
  0xf3   : > { %v1031_v59 = vpop.f32.mrf.mxu0 }
  0xf4   : > { %v1032_v61 = vadd.f32 %v1031_v59, %v1030_v56  ;;  %v1053_v62 = vpop.f32.mrf.mxu1  ;;  %v649_v63 = vadd.f32 %v1051_v60, %v608_v57 }
  0xf5   : > { %v1054_v1 = vadd.f32 %v1053_v62, %v1052_v58 }
  0xf6   : > { %v611_v0 = vadd.f32 %v1032_v61, %v953_v52  ;;  %v655_v3 = vmax.f32 %v649_v63, 0.0 }
  0xf8   : > { %v652_v2 = vadd.f32 %v1054_v1, %v611_v0 }
  0xfa   : > { %v656_v4 = vmax.f32 %v652_v2, 0.0 }
  0xfc   : > { %v657_v5 = vpack.c.bf16 %v656_v4, %v655_v3 }
  0xfe   : > { %1090 = vmatmul.mubr.bf16.vlgmr.msra.gmra.mxu0 %v657_v5 }
 0x1be   : > { %v763_v10 = vpop.f32.mrf.mxu0 }
 0x1bf   : > { %v764_v12 = vadd.f32 %v990_v9, %v763_v10 }
 0x1c0   : > { %v1091_v11 = vpop.f32.mrf.mxu0 }
 0x1c1   : > { %v770_v16 = vmax.f32 %v764_v12, 0.0 }
 0x1c2   : > { %v766_v13 = vpop.f32.mrf.mxu0 }
 0x1c3   : > { %v767_v14 = vadd.f32 %v990_v9, %v766_v13 }
 0x1c4   : > { %v1092_v15 = vpop.f32.mrf.mxu0 }
 0x1c5   : > { %v771_v17 = vmax.f32 %v767_v14, 0.0 }
 0x1c7   : > { %v772_v18 = vpack.c.bf16 %v771_v17, %v770_v16 }
 0x1c9   : > { %1110 = vmatmul.mubr.bf16.vlgmr.msra.gmra.mxu1 %v772_v18 }
 0x289   : > { %v878_v20 = vpop.f32.mrf.mxu1 }
 0x28a   : > { %v879_v21 = vadd.f32 %v999_v19, %v878_v20 }
 0x28b   : > { %v1111_v22 = vpop.f32.mrf.mxu1 }
 0x28c   : > { %885 = vst [vmem:[%s283_s30] sm:$0xff] %v879_v21 }
 0x28d   : > { %v881_v23 = vpop.f32.mrf.mxu1 }
 0x28e   : > { %v882_v24 = vadd.f32 %v999_v19, %v881_v23 }
 0x28f   : > { %v1112_v25 = vpop.f32.mrf.mxu1 }
 0x290   : > { %886 = vst [vmem:[%s283_s30 + $0x8] sm:$0xff] %v882_v24 }
 0x291 PF: > { %s17_s24 = sadd.s32 1, %s1183_s24  }
 0x292   : > { %p14_p4 = scmp.ge.s32.totalorder %s17_s24, 4  }
 0x294   :  { %16 = sbr.rel (!%p14_p4) target bundleno = 1 (0x1), region = 78 }

</bundles_post_ra>
